<compile_context>
chip_gen: v6e
topology: v6e:2x2x1
jax: 0.10.0
libtpu: 0.0.40
codegen_flags: <defaults>
</compile_context>

<pallas_src>
import jax
import jax.numpy as jnp
from jax.experimental import pallas as pl
from jax.experimental.pallas import tpu as pltpu


def _self_attention2_kernel(x_ref, wqkv_ref, bqkv_ref, wo_ref, bo_ref, sigma_ref, o_ref):
    # x_ref:    (1, C, HW)      one batch sample
    # wqkv_ref: (3*Cr, C)       stacked [W_theta; W_phi; W_g]
    # bqkv_ref: (3*Cr, 1)       stacked biases
    # wo_ref:   (C, Cr)         W_attn (output 1x1 conv)
    # bo_ref:   (C, 1)
    # sigma_ref:(1, 1)
    # o_ref:    (1, C, HW)
    cr = wo_ref.shape[1]
    x = x_ref[0].astype(jnp.float32)                                   # (C, HW)

    # Fused theta/phi/g 1x1 convs: (3Cr, C) @ (C, HW) -> (3Cr, HW), single MXU pass.
    tpg = jax.lax.dot_general(
        wqkv_ref[...].astype(jnp.float32), x,
        (((1,), (0,)), ((), ())),
        preferred_element_type=jnp.float32,
    ) + bqkv_ref[...].astype(jnp.float32)                              # bias lane-broadcast

    theta = tpg[0 * cr:1 * cr]                                         # (Cr, HW)
    phi = tpg[1 * cr:2 * cr]                                           # (Cr, HW)
    g = tpg[2 * cr:3 * cr]                                             # (Cr, HW)

    # attn = softmax(theta^T @ phi, axis=-1), shape (HW, HW). Contract the Cr axis
    # directly via dot_general (no explicit transpose materialized).
    logits = jax.lax.dot_general(
        theta, phi, (((0,), (0,)), ((), ())),
        preferred_element_type=jnp.float32,
    )                                                                  # (HW, HW)
    m = jnp.max(logits, axis=-1, keepdims=True)
    p = jnp.exp(logits - m)
    attn = p * pl.reciprocal(jnp.sum(p, axis=-1, keepdims=True), approx=True)

    # attn_g = g @ attn^T : contract the key axis of both operands -> (Cr, HW)
    attn_g = jax.lax.dot_general(
        g, attn, (((1,), (1,)), ((), ())),
        preferred_element_type=jnp.float32,
    )

    # Output 1x1 conv + residual: out = x + sigma * (W_attn @ attn_g + b_attn)
    y = jax.lax.dot_general(
        wo_ref[...].astype(jnp.float32), attn_g,
        (((1,), (0,)), ((), ())),
        preferred_element_type=jnp.float32,
    ) + bo_ref[...].astype(jnp.float32)                                # (C, HW)

    o_ref[0] = (x + sigma_ref[0, 0] * y).astype(o_ref.dtype)


def self_attention2(x, w_theta, b_theta, w_phi, b_phi, w_g, b_g, w_attn, b_attn, sigma):
    """x: (N, C, H, W); w_*: (Cr, C) 1x1-conv weights; w_attn: (C, Cr); sigma: (1,)."""
    N, C, H, W = x.shape
    Cr = w_theta.shape[0]
    HW = H * W

    x3 = x.reshape(N, C, HW)
    w_qkv = jnp.concatenate([w_theta, w_phi, w_g], axis=0)             # (3Cr, C)
    b_qkv = jnp.concatenate([b_theta, b_phi, b_g], axis=0)[:, None]    # (3Cr, 1)
    b_o = b_attn[:, None]                                              # (C, 1)
    sig = jnp.reshape(sigma.astype(jnp.float32), (1, 1))               # (1, 1)

    out3 = pl.pallas_call(
        _self_attention2_kernel,
        out_shape=jax.ShapeDtypeStruct((N, C, HW), x.dtype),
        grid_spec=pltpu.PrefetchScalarGridSpec(
            num_scalar_prefetch=0,
            grid=(N,),
            in_specs=[
                pl.BlockSpec((1, C, HW), lambda b: (b, 0, 0)),   # x, one sample per step
                pl.BlockSpec((3 * Cr, C), lambda b: (0, 0)),     # fused qkv weights
                pl.BlockSpec((3 * Cr, 1), lambda b: (0, 0)),     # fused qkv biases
                pl.BlockSpec((C, Cr), lambda b: (0, 0)),         # output-conv weight
                pl.BlockSpec((C, 1), lambda b: (0, 0)),          # output-conv bias
                pl.BlockSpec((1, 1), lambda b: (0, 0)),          # sigma
            ],
            out_specs=pl.BlockSpec((1, C, HW), lambda b: (b, 0, 0)),
        ),
        compiler_params=pltpu.CompilerParams(
            dimension_semantics=("parallel",),
        ),
    )(x3, w_qkv, b_qkv, w_attn, b_o, sig)

    return out3.reshape(N, C, H, W)


def _reference(x, w_theta, b_theta, w_phi, b_phi, w_g, b_g, w_attn, b_attn, sigma):
    # Pure-JAX reference matching the PyTorch forward.
    N, C, H, W = x.shape
    HW = H * W
    xf = x.reshape(N, C, HW).astype(jnp.float32)
    theta = jnp.einsum("oc,ncs->nos", w_theta, xf) + b_theta[None, :, None]
    phi = jnp.einsum("oc,ncs->nos", w_phi, xf) + b_phi[None, :, None]
    g = jnp.einsum("oc,ncs->nos", w_g, xf) + b_g[None, :, None]
    logits = jnp.einsum("ncq,nck->nqk", theta, phi)            # theta^T @ phi
    attn = jax.nn.softmax(logits, axis=-1)
    attn_g = jnp.einsum("ncs,nqs->ncq", g, attn)               # g @ attn^T
    y = jnp.einsum("oc,ncs->nos", w_attn, attn_g) + b_attn[None, :, None]
    out = xf + sigma.astype(jnp.float32) * y
    return out.reshape(N, C, H, W).astype(x.dtype)


if __name__ == "__main__":
    in_channels, reduction = 32, 8
    channels = in_channels // reduction        # 4
    N, H, W = 2, 16, 16

    key = jax.random.PRNGKey(0)
    ks = jax.random.split(key, 9)

    x = jax.random.normal(ks[0], (N, in_channels, H, W), dtype=jnp.float32)

    s_in = 1.0 / jnp.sqrt(jnp.float32(in_channels))
    s_r = 1.0 / jnp.sqrt(jnp.float32(channels))
    w_theta = s_in * jax.random.normal(ks[1], (channels, in_channels), dtype=jnp.float32)
    w_phi = s_in * jax.random.normal(ks[2], (channels, in_channels), dtype=jnp.float32)
    w_g = s_in * jax.random.normal(ks[3], (channels, in_channels), dtype=jnp.float32)
    b_theta = 0.1 * jax.random.normal(ks[4], (channels,), dtype=jnp.float32)
    b_phi = 0.1 * jax.random.normal(ks[5], (channels,), dtype=jnp.float32)
    b_g = 0.1 * jax.random.normal(ks[6], (channels,), dtype=jnp.float32)
    w_attn = s_r * jax.random.normal(ks[7], (in_channels, channels), dtype=jnp.float32)
    b_attn = 0.1 * jax.random.normal(ks[8], (in_channels,), dtype=jnp.float32)
    # PyTorch initializes sigma to 0 (output == x, trivial); use 0.5 here so the
    # attention path is actually exercised by the check.
    sigma = jnp.array([0.5], dtype=jnp.float32)

    out = self_attention2(x, w_theta, b_theta, w_phi, b_phi, w_g, b_g,
                          w_attn, b_attn, sigma)
    out = jax.block_until_ready(out)

    ref = _reference(x, w_theta, b_theta, w_phi, b_phi, w_g, b_g,
                     w_attn, b_attn, sigma)

    assert out.shape == (N, in_channels, H, W)
    assert jnp.allclose(out, ref, atol=2e-2, rtol=2e-2), float(jnp.max(jnp.abs(out - ref)))

    print("KERNEL_OK")
</pallas_src>

<mosaic_0001>
module attributes {stable_mosaic.version = 11 : i64} {
  func.func @_self_attention2_kernel(%arg0: i32, %arg1: memref<1x32x256xf32, #tpu.memory_space<vmem>>, %arg2: memref<12x32xf32, #tpu.memory_space<vmem>>, %arg3: memref<12x1xf32, #tpu.memory_space<vmem>>, %arg4: memref<32x4xf32, #tpu.memory_space<vmem>>, %arg5: memref<32x1xf32, #tpu.memory_space<vmem>>, %arg6: memref<1x1xf32, #tpu.memory_space<vmem>>, %arg7: memref<1x32x256xf32, #tpu.memory_space<vmem>>) attributes {dimension_semantics = [#tpu.dimension_semantics<parallel>], iteration_bounds = array<i64: 2>, scalar_prefetch = 0 : i64, scratch_operands = 0 : i64, tpu.core_type = #tpu.core_type<tc>, window_params = [{transform_indices = @transform_0, window_bounds = array<i64: 1, 32, 256>}, {pipeline_mode = #tpu.pipeline_mode<synchronous>, transform_indices = @transform_1, window_bounds = array<i64: 12, 32>}, {pipeline_mode = #tpu.pipeline_mode<synchronous>, transform_indices = @transform_2, window_bounds = array<i64: 12, 1>}, {pipeline_mode = #tpu.pipeline_mode<synchronous>, transform_indices = @transform_3, window_bounds = array<i64: 32, 4>}, {pipeline_mode = #tpu.pipeline_mode<synchronous>, transform_indices = @transform_4, window_bounds = array<i64: 32, 1>}, {pipeline_mode = #tpu.pipeline_mode<synchronous>, transform_indices = @transform_5, window_bounds = array<i64: 1, 1>}, {transform_indices = @transform_6, window_bounds = array<i64: 1, 32, 256>}]} {
    %c0 = arith.constant 0 : index
    %c0_0 = arith.constant 0 : index
    %c0_1 = arith.constant 0 : index
    %0 = vector.load %arg1[%c0, %c0_0, %c0_1] : memref<1x32x256xf32, #tpu.memory_space<vmem>>, vector<1x32x256xf32>
    %1 = vector.shape_cast %0 : vector<1x32x256xf32> to vector<32x256xf32>
    %c0_2 = arith.constant 0 : index
    %c0_3 = arith.constant 0 : index
    %2 = vector.load %arg2[%c0_2, %c0_3] : memref<12x32xf32, #tpu.memory_space<vmem>>, vector<12x32xf32>
    %cst = arith.constant dense<0.000000e+00> : vector<12x256xf32>
    %3 = tpu.matmul %2, %1, %cst {dimension_numbers = #tpu.dot_dimension_numbers<[1], [0], [0], [1], [0, 0, 1, 1], [], []>} : vector<12x32xf32>, vector<32x256xf32>, vector<12x256xf32> -> vector<12x256xf32>
    %c0_4 = arith.constant 0 : index
    %c0_5 = arith.constant 0 : index
    %4 = vector.load %arg3[%c0_4, %c0_5] : memref<12x1xf32, #tpu.memory_space<vmem>>, vector<12x1xf32>
    %5 = vector.broadcast %4 : vector<12x1xf32> to vector<12x256xf32>
    %6 = arith.addf %3, %5 : vector<12x256xf32>
    %7 = vector.extract_strided_slice %6 {offsets = [0, 0], sizes = [4, 256], strides = [1, 1]} : vector<12x256xf32> to vector<4x256xf32>
    %8 = vector.extract_strided_slice %6 {offsets = [4, 0], sizes = [4, 256], strides = [1, 1]} : vector<12x256xf32> to vector<4x256xf32>
    %9 = vector.extract_strided_slice %6 {offsets = [8, 0], sizes = [4, 256], strides = [1, 1]} : vector<12x256xf32> to vector<4x256xf32>
    %cst_6 = arith.constant dense<0.000000e+00> : vector<256x256xf32>
    %10 = tpu.matmul %7, %8, %cst_6 {dimension_numbers = #tpu.dot_dimension_numbers<[0], [0], [1], [1], [0, 1, 1, 1], [], []>} : vector<4x256xf32>, vector<4x256xf32>, vector<256x256xf32> -> vector<256x256xf32>
    %cst_7 = arith.constant dense<0xFF800000> : vector<256xf32>
    %11 = vector.multi_reduction <maximumf>, %10, %cst_7 [1] : vector<256x256xf32> to vector<256xf32>
    %12 = vector.shape_cast %11 : vector<256xf32> to vector<256x1xf32>
    %13 = vector.broadcast %12 : vector<256x1xf32> to vector<256x256xf32>
    %14 = arith.subf %10, %13 : vector<256x256xf32>
    %15 = math.exp %14 : vector<256x256xf32>
    %cst_8 = arith.constant dense<0.000000e+00> : vector<256xf32>
    %16 = vector.multi_reduction <add>, %15, %cst_8 [1] : vector<256x256xf32> to vector<256xf32>
    %17 = vector.shape_cast %16 : vector<256xf32> to vector<256x1xf32>
    %18 = tpu.reciprocal %17 {approx = true} : vector<256x1xf32> -> vector<256x1xf32>
    %19 = vector.broadcast %18 : vector<256x1xf32> to vector<256x256xf32>
    %20 = arith.mulf %15, %19 : vector<256x256xf32>
    %cst_9 = arith.constant dense<0.000000e+00> : vector<4x256xf32>
    %21 = tpu.matmul %9, %20, %cst_9 {dimension_numbers = #tpu.dot_dimension_numbers<[1], [1], [0], [0], [0, 0, 1, 0], [], []>} : vector<4x256xf32>, vector<256x256xf32>, vector<4x256xf32> -> vector<4x256xf32>
    %c0_10 = arith.constant 0 : index
    %c0_11 = arith.constant 0 : index
    %22 = vector.load %arg4[%c0_10, %c0_11] : memref<32x4xf32, #tpu.memory_space<vmem>>, vector<32x4xf32>
    %cst_12 = arith.constant dense<0.000000e+00> : vector<32x256xf32>
    %23 = tpu.matmul %22, %21, %cst_12 {dimension_numbers = #tpu.dot_dimension_numbers<[1], [0], [0], [1], [0, 0, 1, 1], [], []>} : vector<32x4xf32>, vector<4x256xf32>, vector<32x256xf32> -> vector<32x256xf32>
    %c0_13 = arith.constant 0 : index
    %c0_14 = arith.constant 0 : index
    %24 = vector.load %arg5[%c0_13, %c0_14] : memref<32x1xf32, #tpu.memory_space<vmem>>, vector<32x1xf32>
    %25 = vector.broadcast %24 : vector<32x1xf32> to vector<32x256xf32>
    %26 = arith.addf %23, %25 : vector<32x256xf32>
    %c0_15 = arith.constant 0 : index
    %c0_16 = arith.constant 0 : index
    %27 = vector.load %arg6[%c0_15, %c0_16] : memref<1x1xf32, #tpu.memory_space<vmem>>, vector<1x1xf32>
    %28 = vector.extract %27[0, 0] : f32 from vector<1x1xf32>
    %29 = vector.broadcast %28 : f32 to vector<32x256xf32>
    %30 = arith.mulf %29, %26 : vector<32x256xf32>
    %31 = arith.addf %1, %30 : vector<32x256xf32>
    %c0_17 = arith.constant 0 : index
    %c0_18 = arith.constant 0 : index
    %c0_19 = arith.constant 0 : index
    %32 = vector.load %arg7[%c0_17, %c0_18, %c0_19] : memref<1x32x256xf32, #tpu.memory_space<vmem>>, vector<1x32x256xf32>
    %33 = vector.shape_cast %32 : vector<1x32x256xf32> to vector<32x256xf32>
    %34 = vector.shape_cast %31 : vector<32x256xf32> to vector<1x32x256xf32>
    tpu.vector_store %arg7[%c0_17, %c0_18, %c0_19], %34 {strides = array<i32>} : memref<1x32x256xf32, #tpu.memory_space<vmem>>, vector<1x32x256xf32>,
    return
  }
  func.func @transform_0(%arg0: i32) -> (i32, i32, i32) {
    %c0_i32 = arith.constant 0 : i32
    %c0_i32_0 = arith.constant 0 : i32
    %c0_i32_1 = arith.constant 0 : i32
    return %arg0, %c0_i32, %c0_i32_0 : i32, i32, i32
  }
  func.func @transform_1(%arg0: i32) -> (i32, i32) {
    %c0_i32 = arith.constant 0 : i32
    %c0_i32_0 = arith.constant 0 : i32
    %c0_i32_1 = arith.constant 0 : i32
    return %c0_i32, %c0_i32_0 : i32, i32
  }
  func.func @transform_2(%arg0: i32) -> (i32, i32) {
    %c0_i32 = arith.constant 0 : i32
    %c0_i32_0 = arith.constant 0 : i32
    %c0_i32_1 = arith.constant 0 : i32
    return %c0_i32, %c0_i32_0 : i32, i32
  }
  func.func @transform_3(%arg0: i32) -> (i32, i32) {
    %c0_i32 = arith.constant 0 : i32
    %c0_i32_0 = arith.constant 0 : i32
    %c0_i32_1 = arith.constant 0 : i32
    return %c0_i32, %c0_i32_0 : i32, i32
  }
  func.func @transform_4(%arg0: i32) -> (i32, i32) {
    %c0_i32 = arith.constant 0 : i32
    %c0_i32_0 = arith.constant 0 : i32
    %c0_i32_1 = arith.constant 0 : i32
    return %c0_i32, %c0_i32_0 : i32, i32
  }
  func.func @transform_5(%arg0: i32) -> (i32, i32) {
    %c0_i32 = arith.constant 0 : i32
    %c0_i32_0 = arith.constant 0 : i32
    %c0_i32_1 = arith.constant 0 : i32
    return %c0_i32, %c0_i32_0 : i32, i32
  }
  func.func @transform_6(%arg0: i32) -> (i32, i32, i32) {
    %c0_i32 = arith.constant 0 : i32
    %c0_i32_0 = arith.constant 0 : i32
    %c0_i32_1 = arith.constant 0 : i32
    return %arg0, %c0_i32, %c0_i32_0 : i32, i32, i32
  }
}

</mosaic_0001>

<bundles_post_ra>
// kernel: tpu_custom_call.1
= control target key start
LH: loop header
LB: loop body
LE: loop exit
PB: predicated region body
PF: predicated region fallthrough
CT: control target
= control target key end

     0   :  { %s2874_s0 = inlined_call_operand.hbm [shape: f32[2,32,256], index: 0, kind: input, shape index: {}]   ;;  %s2875_s1 = inlined_call_operand.vmem [shape: f32[12,32], index: 1, kind: input, shape index: {}]   ;;  %s2876_s2 = inlined_call_operand.vmem [shape: f32[12,1], index: 2, kind: input, shape index: {}]   ;;  %s2877_s3 = inlined_call_operand.vmem [shape: f32[32,4], index: 3, kind: input, shape index: {}]   ;;  %s2878_s4 = inlined_call_operand.vmem [shape: f32[32,1], index: 4, kind: input, shape index: {}]   ;;  %s2879_s5 = inlined_call_operand.<no memory space> [shape: f32[1,1], index: 5, kind: input, shape index: {}]   ;;  %s2880_s6 = inlined_call_operand.hbm [shape: f32[2,32,256], index: 6, kind: output, shape index: {}]  }
   0x1   :  { %v11_v0 = vstv %s2879_s5 }
   0x2   :  { %12 = vst [vmem:[#allocation2] sm:$0x1] %v11_v0 }
   0x3   :  { %13 = vsyncpa [#allocation4], 0 }
   0x4   :  { %15 = vsyncpa [#allocation4 + $0x1], 0 }
   0x5   :  { %16 = vsyncpa [#allocation5], 0 }
   0x6   :  { %18 = vsyncpa [#allocation5 + $0x1], 0  ;;  %s2059_s23 = smov 0   ;;  %s2061_s24 = smov 0  }
   0x7   :  { %s2063_s25 = smov 0   ;;  %s2065_s26 = smov 0  }
   0x8 LB: > { %s2080_s5 = sadd.s32 4294967295, %s2011_s26   ;;  %s1605_s27 = sadd.s32 4294967294, %s2011_s26   ;;  %s2011_s26 = sphi %s2065_s26, %s2974_s26   ;;  %s2007_s25 = sphi %s2063_s25, %s2973_s25   ;;  %s2003_s24 = sphi %s2061_s24, %s2972_s24   ;;  %s1999_s23 = sphi %s2059_s23, %s2971_s23  }
   0x9   : > { %s2084_s28 = sadd.s32 1, %s2011_s26   ;;  %s31_s29 = sadd.s32 1, %s2007_s25 }
   0xa   : > { %s28_s30 = ssub.s32 %s2011_s26, %s2084_s28  ;;  %p38_p0 = scmp.ne.s32.totalorder %s2007_s25, %s2003_s24 }
   0xb   : > { %p29_p1 = scmp.eq.s32.totalorder %s28_s30, 0  ;;  %p39_p2 = scmp.eq.s32.totalorder %s2011_s26, 0 }
   0xc   : > { %p44_p3 = scmp.ne.s32.totalorder %s2003_s24, %s1999_s23  ;;  %p45_p4 = scmp.eq.s32.totalorder %s2080_s5, 0 }
   0xd   : > { %s2096_s7 = scalar_select %p29_p1, %s2007_s25, %s31_s29  }
   0xe   : > { %p2098_p5 = por %p39_p2, %p38_p0  ;;  %p2102_p6 = por %p45_p4, %p44_p3 }
   0xf   : > { %p173_p7 = scmp.eq.s32.totalorder %s2080_s5, 1  ;;  %p179_p8 = scmp.eq.s32.totalorder %s1605_s27, 1 }
  0x10   : > { %s2911_s9 = scalar_select %p2102_p6, 1, 0 }
  0x11   : > { %p1677_p10 = scmp.lt.s32.totalorder %s2011_s26, 2  ;;  %p2109_p11 = por %p173_p7, %p38_p0 }
  0x12   : > { %p2113_p12 = por %p179_p8, %p44_p3  ;;  %s214_s12 = sand.u32 1, %s2007_s25  }
  0x13   : > { %s2912_s10 = scalar_select %p2109_p11, 1, 0 }
  0x14   : > { %s2913_s11 = scalar_select %p2113_p12, 1, 0 }
  0x15   : > { %s1661_s13 = sshll.u32 %s2011_s26, 10  ;;  %s1608_s14 = sshll.u32 %s214_s12, 6 }
  0x16   : > { %s2122_s17 = scalar_lea.hbm %s2874_s0, %s1661_s13  ;;  %s218_s18 = scalar_lea.vmem [#allocation3], %s1608_s14 }
  0x17   : > { %s225_s19 = sshll.u32 %s218_s18, 4  ;;  %p2126_p13 = pnand %p1677_p10, %p2098_p5  ;;  %s2130_s19 = int_to_ptr.vmem [resolvable:$true] %s225_s19 }
  0x18   : > { %s2132_s21 = scalar_lea.sflag [#allocation4], %s214_s12  ;;  %s1919_s22 = scalar_lea.hbm %s2122_s17, 1024 }
  0x19   : > { %p1920_p0 = scmp.ne.s32.totalorder %s2122_s17, %s1919_s22  ;;  %p1921_p1 = pneg %p2126_p13 }
  0x1a   : > { %s1924_s30 = scalar_lea.hbm %s2874_s0, 2048  ;;  %p1925_p4 = scmp.lt.s32.totalorder %s2122_s17, %s2874_s0 }
  0x1b   : > { %p1922_p2 = pnand %p1921_p1, %p1920_p0  ;;  %p1926_p5 = scmp.lt.s32.totalorder %s1924_s30, %s1919_s22 }
  0x1d   : > { %p1923_p3 = pneg %p1922_p2  ;;  %p1927_p7 = por %p1926_p5, %p1925_p4 }
  0x1f   : > { %p1928_p8 = pnand %p1927_p7, %p1923_p3 }
  0x21   : > { %1931 = shalt.err (!%p1928_p8)
}
  0x22   : > { %s1932_s12 = scalar_lea.vmem %s2130_s19, 1024  ;;  %s2013_s14 = smov [#allocation3]  }
  0x23   : > { %p1933_p10 = scmp.ne.s32.totalorder %s2130_s19, %s1932_s12  ;;  %s1937_s15 = sshll.u32 %s2013_s14, 4  ;;  %s1938_s15 = int_to_ptr.vmem [resolvable:$false] %s1937_s15 }
  0x24   : > { %s1939_s16 = scalar_lea.vmem %s1938_s15, 2048  ;;  %p1940_p2 = scmp.lt.s32.totalorder %s2130_s19, %s1938_s15 }
  0x25   : > { %p1935_p9 = pnand %p1933_p10, %p1921_p1  ;;  %p1941_p12 = scmp.lt.s32.totalorder %s1939_s16, %s1932_s12 }
  0x27   : > { %p1936_p0 = pneg %p1935_p9  ;;  %p1942_p11 = por %p1941_p12, %p1940_p2 }
  0x29   : > { %p1943_p6 = pnand %p1942_p11, %p1936_p0 }
  0x2b   : > { %1946 = shalt.err (!%p1943_p6)
}
  0x2c   : > { %s2014_s18 = smov 256   ;;  %s2015_s22 = smov 16  }
  0x2d   : > { %1672 = dma.hbm_to_vmem [thread:$0]  (!%p2126_p13), %s2122_s17, 1024, %s2130_s19, %s2132_s21, %s2014_s18, %s2014_s18, %s2015_s22  }
  0x2e   : > { %p1611_p9 = scmp.ge.s32.totalorder %s2011_s26, 1  ;;  %p233_p1 = scmp.lt.s32.totalorder %s2011_s26, 3 }
  0x30   : > { %p234_p3 = pnand %p1611_p9, %p233_p1 }
  0x32   : > { %237 = sbr.rel (%p234_p3) target bundleno = 1513 (0x5e9), region = 44 }
  0x37   : > { %s2156_s27 = sand.u32 1, %s2003_s24   ;;  %p2915_p6 = scmp.ne.s32.totalorder %s2911_s9, 0 }
  0x38   : > { %s1612_s29 = sshll.u32 %s2156_s27, 6  ;;  %s240_s30 = scalar_lea.sflag [#allocation4], %s2156_s27 }
  0x39   : > { %s2162_s8 = scalar_lea.vmem [#allocation3], %s1612_s29 }
  0x3a   : > { %1990 = dma.done.wait (%p2915_p6), %s240_s30, 1024  }
  0x3b   : > { %1992 = vsyncadd (%p2915_p6), %s240_s30, 4294966272  ;;  %v2883_v1 = vmov 0.0   ;;  %v2017_v2 = vmov 0   ;;  %v279_v3 = vld [vmem:[%s2162_s8 + $0x38] sm:$0xff]  ;;  %v278_v4 = vld [vmem:[%s2162_s8 + $0x30] sm:$0xff]  ;;  %vm294_vm0 = vcmask 261120  }
  0x3c   : > { %365 = vmatprep.mubr.f32.mxu0 %v2883_v1  ;;  %1717 = vset.pattern.permute.xlu0 %v2017_v2  ;;  %v277_v5 = vld [vmem:[%s2162_s8 + $0x28] sm:$0xff]  ;;  %v276_v6 = vld [vmem:[%s2162_s8 + $0x20] sm:$0xff]  ;;  %v275_v7 = vld [vmem:[%s2162_s8 + $0x18] sm:$0xff]  ;;  %vm543_vm1 = vcmask 1043456   ;;  %vm446_vm2 = vcmask 31744   ;;  %s2807_s30 = scalar_lea.vmem [#allocation6], %s1612_s29 }
  0x3d   : > { %612 = vmatprep.mubr.f32.mxu1 %v2883_v1  ;;  %325 = vmatprep.subr.mxu0 %v279_v3  ;;  %v274_v8 = vld [vmem:[%s2162_s8 + $0x10] sm:$0xff]  ;;  %v282_v9 = vld [vmem:[%s2876_s2] sm:$0xff]  ;;  %v273_v10 = vld [vmem:[%s2162_s8 + $0x8] sm:$0xff]  ;;  %s1662_s29 = sshll.u32 %s2080_s5, 10  ;;  %s1532_s9 = sshll.u32 %s2807_s30, 4  ;;  %s2828_s9 = int_to_ptr.vmem [resolvable:$true] %s1532_s9 }
  0x3e   : > { %326 = vmatpush1.msra.mxu0 %v278_v4  ;;  %286 = vperm.xlu0 %1717, %v282_v9   ;;  %v272_v11 = vld [vmem:[%s2162_s8] sm:$0xff]  ;;  %s2826_s20 = scalar_lea.hbm %s2880_s6, %s1662_s29  ;;  %s1519_s5 = scalar_lea.sflag [#allocation5], %s2156_s27 }
  0x3f   : > { %327 = vmatprep.subr.mxu0 %v277_v5  ;;  %v280_v12 = vld [vmem:[%s2875_s1] sm:$0xff]  ;;  %s1947_s21 = scalar_lea.vmem %s2828_s9, 1024  ;;  %p2968_p12 = scmp.ne.s32.totalorder %s2912_s10, 0 }
  0x40   : > { %328 = vmatpush1.msra.mxu0 %v276_v6  ;;  %p1948_p11 = scmp.ne.s32.totalorder %s2828_s9, %s1947_s21  ;;  %s2018_s13 = smov [#allocation6]  }
  0x41   : > { %329 = vmatprep.subr.mxu0 %v275_v7  ;;  %s1951_s12 = sshll.u32 %s2018_s13, 4  ;;  %s1952_s12 = int_to_ptr.vmem [resolvable:$false] %s1951_s12 }
  0x42   : > { %330 = vmatpush1.msra.mxu0 %v274_v8  ;;  %p1949_p13 = pnand %p1948_p11, %p2968_p12  ;;  %s1953_s14 = scalar_lea.vmem %s1952_s12, 2048 }
  0x43   : > { %331 = vmatprep.subr.mxu0 %v273_v10  ;;  %p1954_p5 = scmp.lt.s32.totalorder %s2828_s9, %s1952_s12  ;;  %p1955_p7 = scmp.lt.s32.totalorder %s1953_s14, %s1947_s21 }
  0x44   : > { %332 = vmatpush1.msra.mxu0 %v272_v11  ;;  %p1950_p4 = pneg %p1949_p13 }
  0x45   : > { %1614 = vmatmul.mubr.msk.f32.vlgmr.msra.gmra.mxu0 %vm294_vm0, %v280_v12  ;;  %p1956_p8 = por %p1955_p7, %p1954_p5 }
  0x46   : > { %371 = vmatprep.mubr.f32.mxu0 %v2883_v1 }
  0x47   : > { %p1957_p10 = pnand %p1956_p8, %p1950_p4 }
  0xb9   : > { %v287_v13 = vpop.permute.xlu0 %286 }
 0x105   : > { %v367_v14 = vpop.f32.mrf.mxu0 }
 0x106   : > { %v368_v15 = vadd.f32 %v367_v14, %v287_v13 }
 0x107   : > { %v369_v16 = vpop.f32.mrf.mxu0 }
 0x108   : > { %v370_v17 = vadd.f32 %v369_v16, %v287_v13  ;;  %378 = vxpose.xlu0.b32.start.end [1/1] (short) %v368_v15, 128  ;;  %v444_v19 = vrot.slane %v368_v15, 4 }
 0x10a   : > { %410 = vxpose.xlu1.b32.start.end [1/1] (short) %v370_v17, 128  ;;  %v445_v18 = vrot.slane %v370_v17, 4 }
 0x10c   : > { %1616 = vmatprep.subr.msk.mxu1 %vm543_vm1, %v445_v18 }
 0x10d   : > { %1617 = vmatpush1.msk.msra.mxu1 %vm543_vm1, %v444_v19 }
 0x128   : > { %1718 = vset.pattern.permute.xlu1 %v2017_v2 }
 0x184   : > { %v394_v20 = vpop.trf.xlu0 }
 0x185   : > { %1618 = vmatmul.mubr.msk.f32.vlgmr.msra.gmra.mxu1 %vm446_vm2, %v394_v20 }
 0x186   : > { %618 = vmatprep.mubr.f32.mxu1 %v2883_v1  ;;  %v426_v29 = vpop.trf.xlu1 }
 0x188   : > { %v395_v21 = vpop.trf.xlu0 }
 0x189   : > { %1619 = vmatmul.mubr.msk.f32.gmra.mxu1 %vm446_vm2, %v395_v21 }
 0x18a   : > { %624 = vmatprep.mubr.f32.mxu1 %v2883_v1  ;;  %v427_v31 = vpop.trf.xlu1 }
 0x18c   : > { %v396_v22 = vpop.trf.xlu0 }
 0x18d   : > { %1620 = vmatmul.mubr.msk.f32.gmra.mxu1 %vm446_vm2, %v396_v22 }
 0x18e   : > { %630 = vmatprep.mubr.f32.mxu1 %v2883_v1  ;;  %v428_v34 = vpop.trf.xlu1 }
 0x190   : > { %v397_v23 = vpop.trf.xlu0 }
 0x191   : > { %1621 = vmatmul.mubr.msk.f32.gmra.mxu1 %vm446_vm2, %v397_v23 }
 0x192   : > { %636 = vmatprep.mubr.f32.mxu1 %v2883_v1  ;;  %v429_v36 = vpop.trf.xlu1 }
 0x194   : > { %v398_v24 = vpop.trf.xlu0 }
 0x195   : > { %1622 = vmatmul.mubr.msk.f32.gmra.mxu1 %vm446_vm2, %v398_v24 }
 0x196   : > { %642 = vmatprep.mubr.f32.mxu1 %v2883_v1  ;;  %v430_v39 = vpop.trf.xlu1 }
 0x198   : > { %v399_v25 = vpop.trf.xlu0 }
 0x199   : > { %1623 = vmatmul.mubr.msk.f32.gmra.mxu1 %vm446_vm2, %v399_v25 }
 0x19a   : > { %648 = vmatprep.mubr.f32.mxu1 %v2883_v1  ;;  %v431_v41 = vpop.trf.xlu1 }
 0x19c   : > { %v400_v26 = vpop.trf.xlu0 }
 0x19d   : > { %1624 = vmatmul.mubr.msk.f32.gmra.mxu1 %vm446_vm2, %v400_v26 }
 0x19e   : > { %654 = vmatprep.mubr.f32.mxu1 %v2883_v1  ;;  %v432_v42 = vpop.trf.xlu1 }
 0x1a0   : > { %v401_v27 = vpop.trf.xlu0 }
 0x1a1   : > { %1625 = vmatmul.mubr.msk.f32.gmra.mxu1 %vm446_vm2, %v401_v27 }
 0x1a2   : > { %660 = vmatprep.mubr.f32.mxu1 %v2883_v1  ;;  %v433_v43 = vpop.trf.xlu1 }
 0x1a4   : > { %v402_v28 = vpop.trf.xlu0 }
 0x1a5   : > { %1626 = vmatmul.mubr.msk.f32.gmra.mxu1 %vm446_vm2, %v402_v28 }
 0x1a6   : > { %666 = vmatprep.mubr.f32.mxu1 %v2883_v1  ;;  %v434_v44 = vpop.trf.xlu1 }
 0x1a8   : > { %v403_v30 = vpop.trf.xlu0 }
 0x1a9   : > { %1627 = vmatmul.mubr.msk.f32.gmra.mxu1 %vm446_vm2, %v403_v30 }
 0x1aa   : > { %672 = vmatprep.mubr.f32.mxu1 %v2883_v1  ;;  %v435_v45 = vpop.trf.xlu1 }
 0x1ac   : > { %v404_v32 = vpop.trf.xlu0 }
 0x1ad   : > { %1628 = vmatmul.mubr.msk.f32.gmra.mxu1 %vm446_vm2, %v404_v32 }
 0x1ae   : > { %678 = vmatprep.mubr.f32.mxu1 %v2883_v1  ;;  %v436_v46 = vpop.trf.xlu1 }
 0x1b0   : > { %v405_v33 = vpop.trf.xlu0 }
 0x1b1   : > { %1629 = vmatmul.mubr.msk.f32.gmra.mxu1 %vm446_vm2, %v405_v33 }
 0x1b2   : > { %684 = vmatprep.mubr.f32.mxu1 %v2883_v1  ;;  %v437_v47 = vpop.trf.xlu1 }
 0x1b4   : > { %v406_v35 = vpop.trf.xlu0 }
 0x1b5   : > { %1630 = vmatmul.mubr.msk.f32.gmra.mxu1 %vm446_vm2, %v406_v35 }
 0x1b6   : > { %690 = vmatprep.mubr.f32.mxu1 %v2883_v1  ;;  %v438_v48 = vpop.trf.xlu1 }
 0x1b8   : > { %v407_v37 = vpop.trf.xlu0 }
 0x1b9   : > { %1631 = vmatmul.mubr.msk.f32.gmra.mxu1 %vm446_vm2, %v407_v37 }
 0x1ba   : > { %696 = vmatprep.mubr.f32.mxu1 %v2883_v1  ;;  %v439_v49 = vpop.trf.xlu1 }
 0x1bc   : > { %v408_v38 = vpop.trf.xlu0 }
 0x1bd   : > { %1632 = vmatmul.mubr.msk.f32.gmra.mxu1 %vm446_vm2, %v408_v38 }
 0x1be   : > { %702 = vmatprep.mubr.f32.mxu1 %v2883_v1  ;;  %v440_v50 = vpop.trf.xlu1 }
 0x1c0   : > { %v409_v40 = vpop.trf.xlu0 }
 0x1c1   : > { %1633 = vmatmul.mubr.msk.f32.gmra.mxu1 %vm446_vm2, %v409_v40 }
 0x1c2   : > { %708 = vmatprep.mubr.f32.mxu1 %v2883_v1  ;;  %v441_v51 = vpop.trf.xlu1 }
 0x1c5   : > { %1634 = vmatmul.mubr.msk.f32.gmra.mxu1 %vm446_vm2, %v426_v29 }
 0x1c6   : > { %714 = vmatprep.mubr.f32.mxu1 %v2883_v1 }
 0x1c9   : > { %1635 = vmatmul.mubr.msk.f32.gmra.mxu1 %vm446_vm2, %v427_v31 }
 0x1ca   : > { %720 = vmatprep.mubr.f32.mxu1 %v2883_v1 }
 0x1cd   : > { %1636 = vmatmul.mubr.msk.f32.gmra.mxu1 %vm446_vm2, %v428_v34 }
 0x1ce   : > { %726 = vmatprep.mubr.f32.mxu1 %v2883_v1 }
 0x1d1   : > { %1637 = vmatmul.mubr.msk.f32.gmra.mxu1 %vm446_vm2, %v429_v36 }
 0x1d2   : > { %732 = vmatprep.mubr.f32.mxu1 %v2883_v1 }
 0x1d5   : > { %1638 = vmatmul.mubr.msk.f32.gmra.mxu1 %vm446_vm2, %v430_v39 }
 0x1d6   : > { %738 = vmatprep.mubr.f32.mxu1 %v2883_v1 }
 0x1d9   : > { %1639 = vmatmul.mubr.msk.f32.gmra.mxu1 %vm446_vm2, %v431_v41 }
 0x1da   : > { %744 = vmatprep.mubr.f32.mxu1 %v2883_v1 }
 0x1dd   : > { %1640 = vmatmul.mubr.msk.f32.gmra.mxu1 %vm446_vm2, %v432_v42 }
 0x1de   : > { %750 = vmatprep.mubr.f32.mxu1 %v2883_v1 }
 0x1e1   : > { %1641 = vmatmul.mubr.msk.f32.gmra.mxu1 %vm446_vm2, %v433_v43 }
 0x1e2   : > { %756 = vmatprep.mubr.f32.mxu1 %v2883_v1 }
 0x1e5   : > { %1642 = vmatmul.mubr.msk.f32.gmra.mxu1 %vm446_vm2, %v434_v44 }
 0x1e6   : > { %762 = vmatprep.mubr.f32.mxu1 %v2883_v1 }
 0x1e9   : > { %1643 = vmatmul.mubr.msk.f32.gmra.mxu1 %vm446_vm2, %v435_v45 }
 0x1ea   : > { %768 = vmatprep.mubr.f32.mxu1 %v2883_v1 }
 0x1ed   : > { %1644 = vmatmul.mubr.msk.f32.gmra.mxu1 %vm446_vm2, %v436_v46 }
 0x1ee   : > { %774 = vmatprep.mubr.f32.mxu1 %v2883_v1 }
 0x1f1   : > { %1645 = vmatmul.mubr.msk.f32.gmra.mxu1 %vm446_vm2, %v437_v47 }
 0x1f2   : > { %780 = vmatprep.mubr.f32.mxu1 %v2883_v1 }
 0x1f5   : > { %1646 = vmatmul.mubr.msk.f32.gmra.mxu1 %vm446_vm2, %v438_v48 }
 0x1f6   : > { %786 = vmatprep.mubr.f32.mxu1 %v2883_v1 }
 0x1f9   : > { %1647 = vmatmul.mubr.msk.f32.gmra.mxu1 %vm446_vm2, %v439_v49 }
 0x1fa   : > { %792 = vmatprep.mubr.f32.mxu1 %v2883_v1 }
 0x1fd   : > { %1648 = vmatmul.mubr.msk.f32.gmra.mxu1 %vm446_vm2, %v440_v50 }
 0x1fe   : > { %798 = vmatprep.mubr.f32.mxu1 %v2883_v1 }
 0x201   : > { %1649 = vmatmul.mubr.msk.f32.gmra.mxu1 %vm446_vm2, %v441_v51 }
 0x245   : > { %v2251_v52 = vpop.f32.mrf.mxu1 }
 0x246   : > { %2916 = vst [vmem:[#allocation9_spill] sm:$0xff] %v2251_v52 }
 0x247   : > { %v2253_v53 = vpop.f32.mrf.mxu1 }
 0x248   : > { %2917 = vst [vmem:[#allocation10_spill] sm:$0xff] %v2253_v53  ;;  %v805_v30 = vmax.f32 %v2251_v52, %v2253_v53 }
 0x249   : > { %v2255_v54 = vpop.f32.mrf.mxu1 }
 0x24a   : > { %2918 = vst [vmem:[#allocation11_spill] sm:$0xff] %v2255_v54 }
 0x24b   : > { %v2257_v55 = vpop.f32.mrf.mxu1 }
 0x24c   : > { %2919 = vst [vmem:[#allocation12_spill] sm:$0xff] %v2257_v55 }
 0x24d   : > { %v2259_v56 = vpop.f32.mrf.mxu1 }
 0x24f   : > { %v2261_v57 = vpop.f32.mrf.mxu1 }
 0x250   : > { %v811_v26 = vmax.f32 %v2259_v56, %v2261_v57 }
 0x251   : > { %v2263_v58 = vpop.f32.mrf.mxu1 }
 0x253   : > { %v2265_v59 = vpop.f32.mrf.mxu1 }
 0x254   : > { %2920 = vst [vmem:[#allocation13_spill] sm:$0xff] %v2265_v59 }
 0x255   : > { %v2267_v60 = vpop.f32.mrf.mxu1 }
 0x257   : > { %v2269_v61 = vpop.f32.mrf.mxu1 }
 0x258   : > { %v817_v22 = vmax.f32 %v2267_v60, %v2269_v61 }
 0x259   : > { %v2271_v62 = vpop.f32.mrf.mxu1 }
 0x25b   : > { %v2273_v63 = vpop.f32.mrf.mxu1 }
 0x25d   : > { %v2275_v0 = vpop.f32.mrf.mxu1 }
 0x25f   : > { %v2277_v2 = vpop.f32.mrf.mxu1 }
 0x260   : > { %v823_v49 = vmax.f32 %v2275_v0, %v2277_v2 }
 0x261   : > { %v2279_v3 = vpop.f32.mrf.mxu1 }
 0x263   : > { %v2281_v4 = vpop.f32.mrf.mxu1 }
 0x264   : > { %v826_v46 = vmax.f32 %v2279_v3, %v2281_v4 }
 0x265   : > { %v2283_v5 = vpop.f32.mrf.mxu1 }
 0x267   : > { %v2285_v6 = vpop.f32.mrf.mxu1 }
 0x268   : > { %v829_v43 = vmax.f32 %v2283_v5, %v2285_v6 }
 0x269   : > { %v2287_v7 = vpop.f32.mrf.mxu1 }
 0x26b   : > { %v2289_v8 = vpop.f32.mrf.mxu1 }
 0x26c   : > { %v832_v40 = vmax.f32 %v2287_v7, %v2289_v8 }
 0x26d   : > { %v2291_v9 = vpop.f32.mrf.mxu1 }
 0x26f   : > { %v2293_v10 = vpop.f32.mrf.mxu1 }
 0x270   : > { %v835_v37 = vmax.f32 %v2291_v9, %v2293_v10 }
 0x271   : > { %v2295_v11 = vpop.f32.mrf.mxu1 }
 0x273   : > { %v2297_v12 = vpop.f32.mrf.mxu1 }
 0x274   : > { %v838_v34 = vmax.f32 %v2295_v11, %v2297_v12 }
 0x275   : > { %v2299_v13 = vpop.f32.mrf.mxu1 }
 0x277   : > { %v2301_v14 = vpop.f32.mrf.mxu1 }
 0x278   : > { %v841_v31 = vmax.f32 %v2299_v13, %v2301_v14 }
 0x279   : > { %v2303_v15 = vpop.f32.mrf.mxu1 }
 0x27b   : > { %v2305_v16 = vpop.f32.mrf.mxu1 }
 0x27c   : > { %v844_v27 = vmax.f32 %v2303_v15, %v2305_v16 }
 0x27d   : > { %v2307_v17 = vpop.f32.mrf.mxu1 }
 0x27f   : > { %v2309_v18 = vpop.f32.mrf.mxu1 }
 0x280   : > { %v847_v19 = vmax.f32 %v2307_v17, %v2309_v18 }
 0x281   : > { %v2313_v20 = vpop.f32.mrf.mxu1 }
 0x282   : > { %848 = vmax.xlane.f32.xlu0 %v847_v19  ;;  %v820_v19 = vmax.f32 %v2271_v62, %v2273_v63 }
 0x283   : > { %v2315_v21 = vpop.f32.mrf.mxu1 }
 0x284   : > { %v850_v23 = vmax.f32 %v2313_v20, %v2315_v21 }
 0x285   : > { %v2321_v24 = vpop.f32.mrf.mxu1 }
 0x286   : > { %2921 = vst [vmem:[#allocation14_spill] sm:$0xff] %v2321_v24  ;;  %818 = vmax.xlane.f32.xlu0 %v817_v22  ;;  %851 = vmax.xlane.f32.xlu1 %v850_v23 }
 0x287   : > { %v2323_v25 = vpop.f32.mrf.mxu1 }
 0x288   : > { %2922 = vst [vmem:[#allocation15_spill] sm:$0xff] %v2323_v25 }
 0x289   : > { %v2329_v28 = vpop.f32.mrf.mxu1 }
 0x28a   : > { %2923 = vst [vmem:[#allocation16_spill] sm:$0xff] %v2329_v28  ;;  %812 = vmax.xlane.f32.xlu0 %v811_v26  ;;  %845 = vmax.xlane.f32.xlu1 %v844_v27  ;;  %v814_v26 = vmax.f32 %v2263_v58, %v2265_v59 }
 0x28b   : > { %v2331_v29 = vpop.f32.mrf.mxu1 }
 0x28c   : > { %2924 = vst [vmem:[#allocation17_spill] sm:$0xff] %v2331_v29 }
 0x28d   : > { %v2337_v32 = vpop.f32.mrf.mxu1 }
 0x28e   : > { %2925 = vst [vmem:[#allocation18_spill] sm:$0xff] %v2337_v32  ;;  %806 = vmax.xlane.f32.xlu0 %v805_v30  ;;  %842 = vmax.xlane.f32.xlu1 %v841_v31  ;;  %v808_v31 = vmax.f32 %v2255_v54, %v2257_v55 }
 0x28f   : > { %v2339_v33 = vpop.f32.mrf.mxu1 }
 0x290   : > { %2926 = vst [vmem:[#allocation19_spill] sm:$0xff] %v2339_v33 }
 0x291   : > { %v2343_v35 = vpop.f32.mrf.mxu1 }
 0x292   : > { %2927 = vst [vmem:[#allocation20_spill] sm:$0xff] %v2343_v35  ;;  %839 = vmax.xlane.f32.xlu1 %v838_v34 }
 0x293   : > { %v2345_v36 = vpop.f32.mrf.mxu1 }
 0x294   : > { %2928 = vst [vmem:[#allocation21_spill] sm:$0xff] %v2345_v36 }
 0x295   : > { %v2349_v38 = vpop.f32.mrf.mxu1 }
 0x296   : > { %836 = vmax.xlane.f32.xlu1 %v835_v37 }
 0x297   : > { %v2351_v39 = vpop.f32.mrf.mxu1 }
 0x299   : > { %v2355_v41 = vpop.f32.mrf.mxu1 }
 0x29a   : > { %833 = vmax.xlane.f32.xlu1 %v832_v40 }
 0x29b   : > { %v2357_v42 = vpop.f32.mrf.mxu1 }
 0x29d   : > { %v2361_v44 = vpop.f32.mrf.mxu1 }
 0x29e   : > { %830 = vmax.xlane.f32.xlu1 %v829_v43 }
 0x29f   : > { %v2363_v45 = vpop.f32.mrf.mxu1 }
 0x2a1   : > { %v2367_v47 = vpop.f32.mrf.mxu1 }
 0x2a2   : > { %827 = vmax.xlane.f32.xlu1 %v826_v46 }
 0x2a3   : > { %v2369_v48 = vpop.f32.mrf.mxu1 }
 0x2a5   : > { %v2373_v50 = vpop.f32.mrf.mxu1 }
 0x2a6   : > { %824 = vmax.xlane.f32.xlu1 %v823_v49 }
 0x2a7   : > { %v2375_v51 = vpop.f32.mrf.mxu1 }
 0x2a9   : > { %v2379_v22 = vpop.f32.mrf.mxu1 }
 0x2aa   : > { %821 = vmax.xlane.f32.xlu1 %v820_v19 }
 0x2ab   : > { %v2381_v23 = vpop.f32.mrf.mxu1 }
 0x2ad   : > { %v2385_v27 = vpop.f32.mrf.mxu1 }
 0x2ae   : > { %815 = vmax.xlane.f32.xlu1 %v814_v26 }
 0x2af   : > { %v2387_v30 = vpop.f32.mrf.mxu1 }
 0x2b0   : > { %v883_v52 = vmax.f32 %v2385_v27, %v2387_v30 }
 0x2b1   : > { %v2391_v34 = vpop.f32.mrf.mxu1 }
 0x2b2   : > { %809 = vmax.xlane.f32.xlu1 %v808_v31 }
 0x2b3   : > { %v2393_v37 = vpop.f32.mrf.mxu1 }
 0x2b5   : > { %v2395_v40 = vpop.f32.mrf.mxu1 }
 0x2b7   : > { %v2397_v43 = vpop.f32.mrf.mxu1 }
 0x2b8   : > { %2929 = vst [vmem:[#allocation22_spill] sm:$0xff] %v2397_v43  ;;  %v889_v55 = vmax.f32 %v2395_v40, %v2397_v43  ;;  %v880_v43 = vmax.f32 %v2379_v22, %v2381_v23 }
 0x2b9   : > { %v2399_v46 = vpop.f32.mrf.mxu1 }
 0x2bb   : > { %v2401_v49 = vpop.f32.mrf.mxu1 }
 0x2bc   : > { %v892_v59 = vmax.f32 %v2399_v46, %v2401_v49 }
 0x2bd   : > { %v2403_v19 = vpop.f32.mrf.mxu1 }
 0x2bf   : > { %v2405_v26 = vpop.f32.mrf.mxu1 }
 0x2c0   : > { %v895_v1 = vmax.f32 %v2403_v19, %v2405_v26 }
 0x2c1   : > { %v2409_v53 = vpop.f32.mrf.mxu1 }
 0x2c2   : > { %896 = vmax.xlane.f32.xlu0 %v895_v1  ;;  %v886_v1 = vmax.f32 %v2391_v34, %v2393_v37 }
 0x2c3   : > { %v2411_v31 = vpop.f32.mrf.mxu1 }
 0x2c4   : > { %v898_v54 = vmax.f32 %v2409_v53, %v2411_v31 }
 0x2c6   : > { %890 = vmax.xlane.f32.xlu0 %v889_v55  ;;  %899 = vmax.xlane.f32.xlu1 %v898_v54  ;;  %v877_v55 = vmax.f32 %v2373_v50, %v2375_v51  ;;  %v874_v54 = vmax.f32 %v2367_v47, %v2369_v48 }
 0x2ca   : > { %884 = vmax.xlane.f32.xlu0 %v883_v52  ;;  %893 = vmax.xlane.f32.xlu1 %v892_v59  ;;  %v871_v52 = vmax.f32 %v2361_v44, %v2363_v45  ;;  %v868_v59 = vmax.f32 %v2355_v41, %v2357_v42 }
 0x2ce   : > { %887 = vmax.xlane.f32.xlu1 %v886_v1  ;;  %v865_v1 = vmax.f32 %v2349_v38, %v2351_v39 }
 0x2d2   : > { %881 = vmax.xlane.f32.xlu1 %v880_v43  ;;  %v862_v43 = vmax.f32 %v2343_v35, %v2345_v36 }
 0x2d6   : > { %878 = vmax.xlane.f32.xlu1 %v877_v55  ;;  %v859_v55 = vmax.f32 %v2337_v32, %v2339_v33 }
 0x2da   : > { %875 = vmax.xlane.f32.xlu1 %v874_v54  ;;  %v856_v54 = vmax.f32 %v2329_v28, %v2331_v29 }
 0x2de   : > { %872 = vmax.xlane.f32.xlu1 %v871_v52  ;;  %v853_v52 = vmax.f32 %v2321_v24, %v2323_v25 }
 0x2e2   : > { %869 = vmax.xlane.f32.xlu1 %v868_v59  ;;  %v281_v59 = vld [vmem:[%s2875_s1 + $0x8] sm:$0xf] }
 0x2e3   : > { %1615 = vmatmul.mubr.msk.f32.gmra.mxu0 %vm294_vm0, %v281_v59 }
 0x2e6   : > { %866 = vmax.xlane.f32.xlu1 %v865_v1  ;;  %v2930_v1 = vmov 0.0  }
 0x2e7   : > { %1466 = vmatprep.mubr.f32.mxu0 %v2930_v1 }
 0x2ea   : > { %863 = vmax.xlane.f32.xlu1 %v862_v43 }
 0x2ee   : > { %860 = vmax.xlane.f32.xlu1 %v859_v55 }
 0x2f2   : > { %857 = vmax.xlane.f32.xlu1 %v856_v54 }
 0x2f6   : > { %854 = vmax.xlane.f32.xlu1 %v853_v52 }
 0x30b   : > { %v849_v43 = vpop.xlane.xlu0 %848 }
 0x30c   : > { %v929_v55 = vsub.f32 %v2307_v17, %v849_v43  ;;  %v930_v54 = vsub.f32 %v2309_v18, %v849_v43 }
 0x30e   : > { %v1021_v28 = vmul.f32 1.442695, %v929_v55  ;;  %v1023_v35 = vmul.f32 1.442695, %v930_v54 }
 0x30f   : > { %v852_v36 = vpop.xlane.xlu1 %851 }
 0x310   : > { %v931_v33 = vsub.f32 %v2313_v20, %v852_v36  ;;  %v932_v29 = vsub.f32 %v2315_v21, %v852_v36 }
 0x312   : > { %v1025_v25 = vmul.f32 1.442695, %v931_v33  ;;  %v1027_v52 = vmul.f32 1.442695, %v932_v29 }
 0x313   : > { %v846_v24 = vpop.xlane.xlu1 %845 }
 0x314   : > { %v927_v32 = vsub.f32 %v2303_v15, %v846_v24  ;;  %v928_v59 = vsub.f32 %v2305_v16, %v846_v24  ;;  %1719 = vpow2.f32 %v1025_v25 }
 0x315   : > { %1721 = vpow2.f32 %v1027_v52 }
 0x316   : > { %1723 = vpow2.f32 %v1021_v28  ;;  %v1017_v17 = vmul.f32 1.442695, %v927_v32  ;;  %v1019_v18 = vmul.f32 1.442695, %v928_v59 }
 0x317   : > { %v843_v1 = vpop.xlane.xlu1 %842  ;;  %1725 = vpow2.f32 %v1023_v35 }
 0x318   : > { %v925_v20 = vsub.f32 %v2299_v13, %v843_v1  ;;  %v926_v21 = vsub.f32 %v2301_v14, %v843_v1  ;;  %1727 = vpow2.f32 %v1017_v17 }
 0x319   : > { %1729 = vpow2.f32 %v1019_v18 }
 0x31a   : > { %v1013_v29 = vmul.f32 1.442695, %v925_v20  ;;  %v1015_v15 = vmul.f32 1.442695, %v926_v21 }
 0x31b   : > { %v840_v33 = vpop.xlane.xlu1 %839 }
 0x31c   : > { %v923_v36 = vsub.f32 %v2295_v11, %v840_v33  ;;  %v924_v16 = vsub.f32 %v2297_v12, %v840_v33  ;;  %1731 = vpow2.f32 %v1013_v29 }
 0x31d   : > { %1733 = vpow2.f32 %v1015_v15 }
 0x31e   : > { %v1009_v25 = vmul.f32 1.442695, %v923_v36  ;;  %v1011_v13 = vmul.f32 1.442695, %v924_v16 }
 0x31f   : > { %v837_v24 = vpop.xlane.xlu1 %836 }
 0x320   : > { %v921_v28 = vsub.f32 %v2291_v9, %v837_v24  ;;  %v922_v32 = vsub.f32 %v2293_v10, %v837_v24  ;;  %1735 = vpow2.f32 %v1009_v25 }
 0x321   : > { %v2460_v35 = vpop.eup %1719  ;;  %1737 = vpow2.f32 %v1011_v13 }
 0x322   : > { %v2462_v1 = vpop.eup %1721  ;;  %v1005_v11 = vmul.f32 1.442695, %v921_v28  ;;  %v1007_v12 = vmul.f32 1.442695, %v922_v32 }
 0x323   : > { %v834_v14 = vpop.xlane.xlu1 %833  ;;  %v2465_v55 = vpop.eup %1723  ;;  %v1138_v9 = vadd.f32 %v2462_v1, %v2460_v35 }
 0x324   : > { %v919_v43 = vsub.f32 %v2287_v7, %v834_v14  ;;  %v920_v54 = vsub.f32 %v2289_v8, %v834_v14  ;;  %v2470_v52 = vpop.eup %1725  ;;  %1739 = vpow2.f32 %v1005_v11 }
 0x325   : > { %1139 = vadd.xlane.f32.xlu0 %v1138_v9  ;;  %v2473_v20 = vpop.eup %1727  ;;  %1741 = vpow2.f32 %v1007_v12  ;;  %v1135_v8 = vadd.f32 %v2470_v52, %v2465_v55 }
 0x326   : > { %v1001_v59 = vmul.f32 1.442695, %v919_v43  ;;  %v1003_v7 = vmul.f32 1.442695, %v920_v54  ;;  %v2478_v21 = vpop.eup %1729 }
 0x327   : > { %v831_v10 = vpop.xlane.xlu1 %830 }
 0x328   : > { %v917_v17 = vsub.f32 %v2283_v5, %v831_v10  ;;  %v918_v18 = vsub.f32 %v2285_v6, %v831_v10  ;;  %1743 = vpow2.f32 %v1001_v59  ;;  %v819_v5 = vpop.xlane.xlu0 %818  ;;  %v1132_v6 = vadd.f32 %v2478_v21, %v2473_v20 }
 0x329   : > { %1136 = vadd.xlane.f32.xlu0 %v1135_v8  ;;  %v2481_v15 = vpop.eup %1731  ;;  %1745 = vpow2.f32 %v1003_v7  ;;  %v909_v11 = vsub.f32 %v2267_v60, %v819_v5  ;;  %v910_v9 = vsub.f32 %v2269_v61, %v819_v5 }
 0x32a   : > { %v997_v29 = vmul.f32 1.442695, %v917_v17  ;;  %v999_v16 = vmul.f32 1.442695, %v918_v18  ;;  %v2486_v25 = vpop.eup %1733 }
 0x32b   : > { %v828_v33 = vpop.xlane.xlu1 %827  ;;  %v981_v7 = vmul.f32 1.442695, %v909_v11 }
 0x32c   : > { %v915_v36 = vsub.f32 %v2279_v3, %v828_v33  ;;  %v916_v24 = vsub.f32 %v2281_v4, %v828_v33  ;;  %1747 = vpow2.f32 %v997_v29  ;;  %v1129_v4 = vadd.f32 %v2486_v25, %v2481_v15  ;;  %v813_v10 = vpop.xlane.xlu0 %812 }
 0x32d   : > { %1133 = vadd.xlane.f32.xlu0 %v1132_v6  ;;  %v2490_v14 = vpop.eup %1735  ;;  %1749 = vpow2.f32 %v999_v16  ;;  %v905_v61 = vsub.f32 %v2259_v56, %v813_v10  ;;  %v906_v5 = vsub.f32 %v2261_v57, %v813_v10  ;;  %v2931_v16 = vld [vmem:[#allocation13_spill] sm:$0xff]  ;;  %v2934_v10 = vld [vmem:[#allocation12_spill] sm:$0xff] }
 0x32e   : > { %v993_v13 = vmul.f32 1.442695, %v915_v36  ;;  %v995_v43 = vmul.f32 1.442695, %v916_v24  ;;  %v2495_v12 = vpop.eup %1737  ;;  %v983_v36 = vmul.f32 1.442695, %v910_v9 }
 0x32f   : > { %v825_v28 = vpop.xlane.xlu1 %824  ;;  %v1126_v18 = vadd.f32 %v2495_v12, %v2490_v14  ;;  %v975_v11 = vmul.f32 1.442695, %v906_v5 }
 0x330   : > { %v913_v32 = vsub.f32 %v2275_v0, %v825_v28  ;;  %v914_v3 = vsub.f32 %v2277_v2, %v825_v28  ;;  %1751 = vpow2.f32 %v993_v13  ;;  %v807_v28 = vpop.xlane.xlu0 %806 }
 0x331   : > { %1130 = vadd.xlane.f32.xlu0 %v1129_v4  ;;  %v2500_v60 = vpop.eup %1739  ;;  %1753 = vpow2.f32 %v995_v43 }
 0x332   : > { %v989_v54 = vmul.f32 1.442695, %v913_v32  ;;  %v991_v59 = vmul.f32 1.442695, %v914_v3  ;;  %v2504_v8 = vpop.eup %1741  ;;  %v973_v32 = vmul.f32 1.442695, %v905_v61 }
 0x333   : > { %v822_v0 = vpop.xlane.xlu1 %821  ;;  %v1123_v56 = vadd.f32 %v2504_v8, %v2500_v60 }
 0x334   : > { %v911_v2 = vsub.f32 %v2271_v62, %v822_v0  ;;  %v912_v17 = vsub.f32 %v2273_v63, %v822_v0  ;;  %1755 = vpow2.f32 %v989_v54  ;;  %v2933_v54 = vld [vmem:[#allocation11_spill] sm:$0xff] }
 0x335   : > { %1757 = vpow2.f32 %v991_v59  ;;  %1127 = vadd.xlane.f32.xlu0 %v1126_v18  ;;  %v2510_v6 = vpop.eup %1743 }
 0x336   : > { %v985_v33 = vmul.f32 1.442695, %v911_v2  ;;  %v987_v29 = vmul.f32 1.442695, %v912_v17  ;;  %v2514_v13 = vpop.eup %1745  ;;  %v2935_v2 = vld [vmem:[#allocation10_spill] sm:$0xff] }
 0x337   : > { %v816_v62 = vpop.xlane.xlu1 %815  ;;  %v902_v17 = vsub.f32 %v2935_v2, %v807_v28 }
 0x338   : > { %1759 = vpow2.f32 %v985_v33  ;;  %v907_v63 = vsub.f32 %v2263_v58, %v816_v62  ;;  %v908_v24 = vsub.f32 %v2931_v16, %v816_v62  ;;  %v2932_v58 = vld [vmem:[#allocation9_spill] sm:$0xff] }
 0x339   : > { %1761 = vpow2.f32 %v987_v29  ;;  %1124 = vadd.xlane.f32.xlu0 %v1123_v56  ;;  %v901_v4 = vsub.f32 %v2932_v58, %v807_v28  ;;  %v2519_v0 = vpop.eup %1747  ;;  %v967_v5 = vmul.f32 1.442695, %v902_v17 }
 0x33a   : > { %1763 = vpow2.f32 %v981_v7  ;;  %v977_v57 = vmul.f32 1.442695, %v907_v63  ;;  %v979_v3 = vmul.f32 1.442695, %v908_v24  ;;  %v1120_v7 = vadd.f32 %v2514_v13, %v2510_v6  ;;  %v2524_v18 = vpop.eup %1749 }
 0x33b   : > { %1765 = vpow2.f32 %v983_v36  ;;  %v810_v43 = vpop.xlane.xlu1 %809  ;;  %v965_v29 = vmul.f32 1.442695, %v901_v4  ;;  %v1117_v62 = vadd.f32 %v2524_v18, %v2519_v0 }
 0x33c   : > { %1767 = vpow2.f32 %v977_v57  ;;  %v903_v9 = vsub.f32 %v2933_v54, %v810_v43  ;;  %v904_v59 = vsub.f32 %v2934_v10, %v810_v43 }
 0x33d   : > { %1769 = vpow2.f32 %v979_v3  ;;  %1121 = vadd.xlane.f32.xlu0 %v1120_v7  ;;  %v2526_v36 = vpop.eup %1751 }
 0x33e   : > { %1771 = vpow2.f32 %v973_v32  ;;  %v969_v61 = vmul.f32 1.442695, %v903_v9  ;;  %v971_v33 = vmul.f32 1.442695, %v904_v59  ;;  %v2530_v63 = vpop.eup %1753 }
 0x33f   : > { %1773 = vpow2.f32 %v975_v11  ;;  %v1114_v56 = vadd.f32 %v2530_v63, %v2526_v36 }
 0x340   : > { %1775 = vpow2.f32 %v969_v61 }
 0x341   : > { %1777 = vpow2.f32 %v971_v33  ;;  %v2532_v16 = vpop.eup %1755  ;;  %1118 = vadd.xlane.f32.xlu0 %v1117_v62 }
 0x342   : > { %v2534_v24 = vpop.eup %1757  ;;  %1779 = vpow2.f32 %v965_v29 }
 0x343   : > { %1781 = vpow2.f32 %v967_v5  ;;  %v1111_v58 = vadd.f32 %v2534_v24, %v2532_v16 }
 0x345   : > { %v2536_v28 = vpop.eup %1759  ;;  %1115 = vadd.xlane.f32.xlu0 %v1114_v56 }
 0x346   : > { %v2540_v32 = vpop.eup %1761 }
 0x347   : > { %v2542_v57 = vpop.eup %1763  ;;  %v1108_v3 = vadd.f32 %v2540_v32, %v2536_v28 }
 0x348   : > { %v2546_v11 = vpop.eup %1765 }
 0x349   : > { %v2548_v43 = vpop.eup %1767  ;;  %1109 = vadd.xlane.f32.xlu1 %v1108_v3  ;;  %1112 = vadd.xlane.f32.xlu0 %v1111_v58  ;;  %v1105_v61 = vadd.f32 %v2546_v11, %v2542_v57 }
 0x34a   : > { %2936 = vst [vmem:[#allocation13_spill] sm:$0xff] %v2548_v43  ;;  %v2552_v4 = vpop.eup %1769 }
 0x34b   : > { %v2554_v54 = vpop.eup %1771  ;;  %v897_v9 = vpop.xlane.xlu0 %896  ;;  %v1102_v10 = vadd.f32 %v2552_v4, %v2548_v43 }
 0x34c   : > { %v2558_v59 = vpop.eup %1773  ;;  %v961_v2 = vsub.f32 %v2403_v19, %v897_v9  ;;  %v962_v17 = vsub.f32 %v2405_v26, %v897_v9  ;;  %v2939_v26 = vld [vmem:[#allocation22_spill] sm:$0xff] }
 0x34d   : > { %v2562_v7 = vpop.eup %1775  ;;  %1103 = vadd.xlane.f32.xlu1 %v1102_v10  ;;  %1106 = vadd.xlane.f32.xlu0 %v1105_v61 }
 0x34e   : > { %2937 = vst [vmem:[#allocation9_spill] sm:$0xff] %v2562_v7  ;;  %v2566_v33 = vpop.eup %1777  ;;  %v1085_v29 = vmul.f32 1.442695, %v961_v2  ;;  %v1087_v5 = vmul.f32 1.442695, %v962_v17  ;;  %v1099_v2 = vadd.f32 %v2558_v59, %v2554_v54 }
 0x34f   : > { %2938 = vst [vmem:[#allocation11_spill] sm:$0xff] %v2566_v33  ;;  %v891_v62 = vpop.xlane.xlu0 %890  ;;  %v900_v56 = vpop.xlane.xlu1 %899  ;;  %v1096_v3 = vadd.f32 %v2566_v33, %v2562_v7 }
 0x350   : > { %1783 = vpow2.f32 %v1085_v29  ;;  %v957_v19 = vsub.f32 %v2395_v40, %v891_v62  ;;  %v958_v58 = vsub.f32 %v2939_v26, %v891_v62  ;;  %v963_v9 = vsub.f32 %v2409_v53, %v900_v56  ;;  %v2573_v43 = vpop.eup %1779 }
 0x351   : > { %1785 = vpow2.f32 %v1087_v5  ;;  %v964_v10 = vsub.f32 %v2411_v31, %v900_v56  ;;  %1097 = vadd.xlane.f32.xlu1 %v1096_v3  ;;  %v2578_v17 = vpop.eup %1781  ;;  %1100 = vadd.xlane.f32.xlu0 %v1099_v2 }
 0x352   : > { %v1077_v61 = vmul.f32 1.442695, %v957_v19  ;;  %v1079_v7 = vmul.f32 1.442695, %v958_v58  ;;  %v1089_v29 = vmul.f32 1.442695, %v963_v9  ;;  %v1093_v3 = vadd.f32 %v2578_v17, %v2573_v43 }
 0x353   : > { %v1091_v33 = vmul.f32 1.442695, %v964_v10  ;;  %v885_v40 = vpop.xlane.xlu0 %884  ;;  %v894_v62 = vpop.xlane.xlu1 %893 }
 0x354   : > { %1787 = vpow2.f32 %v1077_v61  ;;  %v953_v53 = vsub.f32 %v2385_v27, %v885_v40  ;;  %v954_v5 = vsub.f32 %v2387_v30, %v885_v40  ;;  %v959_v31 = vsub.f32 %v2399_v46, %v894_v62 }
 0x355   : > { %1789 = vpow2.f32 %v1079_v7  ;;  %v960_v56 = vsub.f32 %v2401_v49, %v894_v62  ;;  %1094 = vadd.xlane.f32.xlu0 %v1093_v3 }
 0x356   : > { %1791 = vpow2.f32 %v1089_v29  ;;  %v1069_v19 = vmul.f32 1.442695, %v953_v53  ;;  %v1071_v26 = vmul.f32 1.442695, %v954_v5  ;;  %v1081_v58 = vmul.f32 1.442695, %v959_v31 }
 0x357   : > { %1793 = vpow2.f32 %v1091_v33  ;;  %v1083_v9 = vmul.f32 1.442695, %v960_v56  ;;  %v888_v10 = vpop.xlane.xlu1 %887 }
 0x358   : > { %1795 = vpow2.f32 %v1069_v19  ;;  %v955_v27 = vsub.f32 %v2391_v34, %v888_v10  ;;  %v956_v30 = vsub.f32 %v2393_v37, %v888_v10 }
 0x359   : > { %1797 = vpow2.f32 %v1071_v26 }
 0x35a   : > { %1799 = vpow2.f32 %v1081_v58  ;;  %v1073_v46 = vmul.f32 1.442695, %v955_v27  ;;  %v1075_v49 = vmul.f32 1.442695, %v956_v30 }
 0x35b   : > { %1801 = vpow2.f32 %v1083_v9  ;;  %v882_v7 = vpop.xlane.xlu1 %881 }
 0x35c   : > { %1803 = vpow2.f32 %v1073_v46  ;;  %v951_v2 = vsub.f32 %v2379_v22, %v882_v7  ;;  %v952_v61 = vsub.f32 %v2381_v23, %v882_v7 }
 0x35d   : > { %v2590_v33 = vpop.eup %1783  ;;  %1805 = vpow2.f32 %v1075_v49 }
 0x35e   : > { %v2592_v29 = vpop.eup %1785  ;;  %v1065_v40 = vmul.f32 1.442695, %v951_v2  ;;  %v1067_v34 = vmul.f32 1.442695, %v952_v61 }
 0x35f   : > { %v879_v62 = vpop.xlane.xlu1 %878  ;;  %v1183_v37 = vadd.f32 %v2592_v29, %v2590_v33 }
 0x360   : > { %1807 = vpow2.f32 %v1065_v40  ;;  %v949_v53 = vsub.f32 %v2373_v50, %v879_v62  ;;  %v950_v5 = vsub.f32 %v2375_v51, %v879_v62 }
 0x361   : > { %v2598_v31 = vpop.eup %1787  ;;  %1809 = vpow2.f32 %v1067_v34  ;;  %1184 = vadd.xlane.f32.xlu0 %v1183_v37 }
 0x362   : > { %v2600_v22 = vpop.eup %1789  ;;  %v1061_v23 = vmul.f32 1.442695, %v949_v53  ;;  %v1063_v56 = vmul.f32 1.442695, %v950_v5 }
 0x363   : > { %v2602_v3 = vpop.eup %1791  ;;  %v876_v19 = vpop.xlane.xlu1 %875  ;;  %v1177_v26 = vadd.f32 %v2600_v22, %v2598_v31 }
 0x364   : > { %v2606_v58 = vpop.eup %1793  ;;  %1811 = vpow2.f32 %v1061_v23  ;;  %v947_v50 = vsub.f32 %v2367_v47, %v876_v19  ;;  %v948_v51 = vsub.f32 %v2369_v48, %v876_v19 }
 0x365   : > { %v2610_v9 = vpop.eup %1795  ;;  %1813 = vpow2.f32 %v1063_v56  ;;  %1178 = vadd.xlane.f32.xlu0 %v1177_v26  ;;  %v1186_v10 = vadd.f32 %v2606_v58, %v2602_v3 }
 0x366   : > { %v2614_v27 = vpop.eup %1797  ;;  %v1057_v30 = vmul.f32 1.442695, %v947_v50  ;;  %v1059_v46 = vmul.f32 1.442695, %v948_v51 }
 0x367   : > { %v2616_v49 = vpop.eup %1799  ;;  %1187 = vadd.xlane.f32.xlu1 %v1186_v10  ;;  %v873_v7 = vpop.xlane.xlu1 %872  ;;  %v1171_v47 = vadd.f32 %v2614_v27, %v2610_v9 }
 0x368   : > { %v2620_v2 = vpop.eup %1801  ;;  %1815 = vpow2.f32 %v1057_v30  ;;  %v945_v48 = vsub.f32 %v2361_v44, %v873_v7  ;;  %v946_v61 = vsub.f32 %v2363_v45, %v873_v7 }
 0x369   : > { %v2624_v40 = vpop.eup %1803  ;;  %1817 = vpow2.f32 %v1059_v46  ;;  %1172 = vadd.xlane.f32.xlu0 %v1171_v47  ;;  %v1180_v34 = vadd.f32 %v2620_v2, %v2616_v49 }
 0x36a   : > { %v2628_v62 = vpop.eup %1805  ;;  %v1053_v37 = vmul.f32 1.442695, %v945_v48  ;;  %v1055_v53 = vmul.f32 1.442695, %v946_v61 }
 0x36b   : > { %1181 = vadd.xlane.f32.xlu1 %v1180_v34  ;;  %v870_v5 = vpop.xlane.xlu1 %869  ;;  %v1174_v23 = vadd.f32 %v2628_v62, %v2624_v40  ;;  %v2940_v34 = vld [vmem:[#allocation20_spill] sm:$0xff] }
 0x36c   : > { %1819 = vpow2.f32 %v1053_v37  ;;  %v943_v44 = vsub.f32 %v2355_v41, %v870_v5  ;;  %v944_v45 = vsub.f32 %v2357_v42, %v870_v5 }
 0x36d   : > { %v2634_v56 = vpop.eup %1807  ;;  %1821 = vpow2.f32 %v1055_v53  ;;  %v2941_v53 = vld [vmem:[#allocation21_spill] sm:$0xff] }
 0x36e   : > { %v2636_v19 = vpop.eup %1809  ;;  %v1049_v26 = vmul.f32 1.442695, %v943_v44  ;;  %v1051_v50 = vmul.f32 1.442695, %v944_v45 }
 0x36f   : > { %1175 = vadd.xlane.f32.xlu1 %v1174_v23  ;;  %v867_v51 = vpop.xlane.xlu1 %866  ;;  %v1168_v10 = vadd.f32 %v2636_v19, %v2634_v56 }
 0x370   : > { %1823 = vpow2.f32 %v1049_v26  ;;  %v941_v30 = vsub.f32 %v2349_v38, %v867_v51  ;;  %v942_v46 = vsub.f32 %v2351_v39, %v867_v51 }
 0x371   : > { %v2642_v41 = vpop.eup %1811  ;;  %1825 = vpow2.f32 %v1051_v50  ;;  %v2942_v50 = vld [vmem:[#allocation18_spill] sm:$0xff] }
 0x372   : > { %v2644_v42 = vpop.eup %1813  ;;  %v1045_v7 = vmul.f32 1.442695, %v941_v30  ;;  %v1047_v47 = vmul.f32 1.442695, %v942_v46 }
 0x373   : > { %1169 = vadd.xlane.f32.xlu1 %v1168_v10  ;;  %v864_v48 = vpop.xlane.xlu1 %863  ;;  %v1165_v61 = vadd.f32 %v2644_v42, %v2642_v41  ;;  %v2943_v10 = vld [vmem:[#allocation19_spill] sm:$0xff] }
 0x374   : > { %1827 = vpow2.f32 %v1045_v7  ;;  %v939_v37 = vsub.f32 %v2940_v34, %v864_v48  ;;  %v940_v5 = vsub.f32 %v2941_v53, %v864_v48 }
 0x375   : > { %v2650_v38 = vpop.eup %1815  ;;  %1829 = vpow2.f32 %v1047_v47  ;;  %1166 = vadd.xlane.f32.xlu0 %v1165_v61 }
 0x376   : > { %v2652_v39 = vpop.eup %1817  ;;  %v1041_v23 = vmul.f32 1.442695, %v939_v37  ;;  %v1043_v44 = vmul.f32 1.442695, %v940_v5  ;;  %v2946_v37 = vld [vmem:[#allocation16_spill] sm:$0xff]  ;;  %v2947_v5 = vld [vmem:[#allocation17_spill] sm:$0xff] }
 0x377   : > { %v861_v45 = vpop.xlane.xlu1 %860  ;;  %v1162_v26 = vadd.f32 %v2652_v39, %v2650_v38 }
 0x378   : > { %1831 = vpow2.f32 %v1041_v23  ;;  %v937_v51 = vsub.f32 %v2942_v50, %v861_v45  ;;  %v938_v30 = vsub.f32 %v2943_v10, %v861_v45 }
 0x379   : > { %v2658_v46 = vpop.eup %1819  ;;  %1833 = vpow2.f32 %v1043_v44  ;;  %1163 = vadd.xlane.f32.xlu1 %v1162_v26 }
 0x37a   : > { %2944 = vst [vmem:[#allocation12_spill] sm:$0xff] %v2658_v46  ;;  %v2660_v7 = vpop.eup %1821  ;;  %v1037_v47 = vmul.f32 1.442695, %v937_v51  ;;  %v1039_v48 = vmul.f32 1.442695, %v938_v30  ;;  %v2948_v30 = vld [vmem:[#allocation14_spill] sm:$0xff] }
 0x37b   : > { %2945 = vst [vmem:[#allocation10_spill] sm:$0xff] %v2660_v7  ;;  %v858_v61 = vpop.xlane.xlu1 %857  ;;  %v1159_v34 = vadd.f32 %v2660_v7, %v2658_v46 }
 0x37c   : > { %1835 = vpow2.f32 %v1037_v47  ;;  %v935_v53 = vsub.f32 %v2946_v37, %v858_v61  ;;  %v936_v23 = vsub.f32 %v2947_v5, %v858_v61  ;;  %v2949_v47 = vld [vmem:[#allocation15_spill] sm:$0xff] }
 0x37d   : > { %v2666_v50 = vpop.eup %1823  ;;  %1837 = vpow2.f32 %v1039_v48  ;;  %1160 = vadd.xlane.f32.xlu0 %v1159_v34 }
 0x37e   : > { %v2668_v45 = vpop.eup %1825  ;;  %v1033_v44 = vmul.f32 1.442695, %v935_v53  ;;  %v1035_v26 = vmul.f32 1.442695, %v936_v23 }
 0x37f   : > { %v855_v10 = vpop.xlane.xlu1 %854  ;;  %v1156_v51 = vadd.f32 %v2668_v45, %v2666_v50 }
 0x380   : > { %1839 = vpow2.f32 %v1033_v44  ;;  %v933_v46 = vsub.f32 %v2948_v30, %v855_v10  ;;  %v934_v7 = vsub.f32 %v2949_v47, %v855_v10 }
 0x381   : > { %v2674_v37 = vpop.eup %1827  ;;  %1841 = vpow2.f32 %v1035_v26  ;;  %1157 = vadd.xlane.f32.xlu1 %v1156_v51 }
 0x382   : > { %v2676_v61 = vpop.eup %1829  ;;  %v1029_v48 = vmul.f32 1.442695, %v933_v46  ;;  %v1031_v34 = vmul.f32 1.442695, %v934_v7 }
 0x383   : > { %v1153_v53 = vadd.f32 %v2676_v61, %v2674_v37 }
 0x384   : > { %1843 = vpow2.f32 %v1029_v48 }
 0x385   : > { %v2680_v5 = vpop.eup %1831  ;;  %1845 = vpow2.f32 %v1031_v34  ;;  %1154 = vadd.xlane.f32.xlu0 %v1153_v53  ;;  %v283_v53 = vld [vmem:[%s2876_s2 + $0x8] sm:$0xf] }
 0x386   : > { %v2682_v23 = vpop.eup %1833 }
 0x387   : > { %v1150_v44 = vadd.f32 %v2682_v23, %v2680_v5 }
 0x389   : > { %v2686_v10 = vpop.eup %1835  ;;  %1151 = vadd.xlane.f32.xlu1 %v1150_v44  ;;  %v1361_v44 = vld [vmem:[%s2878_s4 + $0x8] sm:$0xff] }
 0x38a   : > { %2950 = vst [vmem:[#allocation22_spill] sm:$0xff] %v2686_v10  ;;  %v2688_v26 = vpop.eup %1837 }
 0x38b   : > { %2951 = vst [vmem:[#allocation20_spill] sm:$0xff] %v2688_v26  ;;  %v1147_v46 = vadd.f32 %v2688_v26, %v2686_v10 }
 0x38d   : > { %v2692_v7 = vpop.eup %1839  ;;  %1148 = vadd.xlane.f32.xlu0 %v1147_v46  ;;  %v1362_v46 = vld [vmem:[%s2878_s4 + $0x10] sm:$0xff] }
 0x38e   : > { %2952 = vst [vmem:[#allocation21_spill] sm:$0xff] %v2692_v7  ;;  %v2694_v51 = vpop.eup %1841 }
 0x38f   : > { %2953 = vst [vmem:[#allocation18_spill] sm:$0xff] %v2694_v51  ;;  %v1144_v30 = vadd.f32 %v2694_v51, %v2692_v7 }
 0x391   : > { %v2698_v47 = vpop.eup %1843  ;;  %1145 = vadd.xlane.f32.xlu1 %v1144_v30  ;;  %v1360_v30 = vld [vmem:[%s2878_s4] sm:$0xff] }
 0x392   : > { %2954 = vst [vmem:[#allocation19_spill] sm:$0xff] %v2698_v47  ;;  %v2700_v48 = vpop.eup %1845 }
 0x393   : > { %2955 = vst [vmem:[#allocation16_spill] sm:$0xff] %v2700_v48  ;;  %v1141_v34 = vadd.f32 %v2700_v48, %v2698_v47 }
 0x395   : > { %1142 = vadd.xlane.f32.xlu0 %v1141_v34  ;;  %v1363_v34 = vld [vmem:[%s2878_s4 + $0x18] sm:$0xff] }
 0x3a2   : > { %291 = vperm.xlu1 %1718, %v283_v53  }
 0x3a6   : > { %1371 = vperm.xlu1 %1718, %v1361_v44  }
 0x3aa   : > { %1376 = vperm.xlu1 %1718, %v1362_v46  }
 0x3ab   : > { %1366 = vperm.xlu0 %1717, %v1360_v30  }
 0x3ae   : > { %1381 = vperm.xlu1 %1718, %v1363_v34   ;;  %v1140_v53 = vpop.xlane.xlu0 %1139 }
 0x3af   : > { %1847 = vrcp.f32 %v1140_v53 }
 0x3b2   : > { %v1137_v47 = vpop.xlane.xlu0 %1136 }
 0x3b3   : > { %1849 = vrcp.f32 %v1137_v47 }
 0x3b6   : > { %v1134_v44 = vpop.xlane.xlu0 %1133 }
 0x3b7   : > { %1851 = vrcp.f32 %v1134_v44 }
 0x3ba   : > { %v1131_v48 = vpop.xlane.xlu0 %1130 }
 0x3bb   : > { %1853 = vrcp.f32 %v1131_v48 }
 0x3bc   : > { %v1848_v7 = vpop.eup %1847 }
 0x3bd   : > { %v1252_v51 = vmul.f32 %v1848_v7, %v2462_v1  ;;  %v1251_v10 = vmul.f32 %v1848_v7, %v2460_v35 }
 0x3be   : > { %v1128_v46 = vpop.xlane.xlu0 %1127 }
 0x3bf   : > { %1855 = vrcp.f32 %v1128_v46  ;;  %1285 = vmatprep.subr.mxu1 %v1252_v51 }
 0x3c0   : > { %v1850_v30 = vpop.eup %1849  ;;  %1286 = vmatpush1.xpose.msra.mxu1 %v1251_v10 }
 0x3c1   : > { %v1250_v34 = vmul.f32 %v1850_v30, %v2470_v52  ;;  %v1249_v53 = vmul.f32 %v1850_v30, %v2465_v55 }
 0x3c2   : > { %v1125_v26 = vpop.xlane.xlu0 %1124 }
 0x3c3   : > { %1857 = vrcp.f32 %v1125_v26  ;;  %1287 = vmatprep.subr.mxu1 %v1250_v34 }
 0x3c4   : > { %v1852_v47 = vpop.eup %1851  ;;  %1288 = vmatpush1.xpose.msra.mxu1 %v1249_v53 }
 0x3c5   : > { %v1248_v48 = vmul.f32 %v1852_v47, %v2478_v21  ;;  %v1247_v1 = vmul.f32 %v1852_v47, %v2473_v20 }
 0x3c6   : > { %v1122_v44 = vpop.xlane.xlu0 %1121 }
 0x3c7   : > { %1859 = vrcp.f32 %v1122_v44  ;;  %1289 = vmatprep.subr.mxu1 %v1248_v48 }
 0x3c8   : > { %v1854_v35 = vpop.eup %1853  ;;  %1290 = vmatpush1.xpose.msra.mxu1 %v1247_v1 }
 0x3c9   : > { %v1246_v10 = vmul.f32 %v1854_v35, %v2486_v25  ;;  %v1245_v52 = vmul.f32 %v1854_v35, %v2481_v15 }
 0x3ca   : > { %v1119_v7 = vpop.xlane.xlu0 %1118 }
 0x3cb   : > { %1861 = vrcp.f32 %v1119_v7  ;;  %1291 = vmatprep.subr.mxu1 %v1246_v10 }
 0x3cc   : > { %v1856_v55 = vpop.eup %1855  ;;  %1292 = vmatpush1.xpose.msra.mxu1 %v1245_v52 }
 0x3cd   : > { %v1244_v26 = vmul.f32 %v1856_v55, %v2495_v12  ;;  %v1243_v21 = vmul.f32 %v1856_v55, %v2490_v14 }
 0x3ce   : > { %v1116_v51 = vpop.xlane.xlu0 %1115 }
 0x3cf   : > { %1863 = vrcp.f32 %v1116_v51  ;;  %1293 = vmatprep.subr.mxu1 %v1244_v26 }
 0x3d0   : > { %v1858_v20 = vpop.eup %1857  ;;  %1294 = vmatpush1.xpose.msra.mxu1 %v1243_v21 }
 0x3d1   : > { %v1242_v30 = vmul.f32 %v1858_v20, %v2504_v8  ;;  %v1241_v25 = vmul.f32 %v1858_v20, %v2500_v60 }
 0x3d2   : > { %v1110_v46 = vpop.xlane.xlu1 %1109  ;;  %v1113_v15 = vpop.xlane.xlu0 %1112 }
 0x3d3   : > { %1865 = vrcp.f32 %v1110_v46  ;;  %1295 = vmatprep.subr.mxu1 %v1242_v30  ;;  %v2956_v46 = vld [vmem:[#allocation13_spill] sm:$0xff] }
 0x3d4   : > { %1867 = vrcp.f32 %v1113_v15  ;;  %v1860_v34 = vpop.eup %1859  ;;  %1296 = vmatpush1.xpose.msra.mxu1 %v1241_v25 }
 0x3d5   : > { %v1240_v12 = vmul.f32 %v1860_v34, %v2514_v13  ;;  %v1239_v14 = vmul.f32 %v1860_v34, %v2510_v6 }
 0x3d6   : > { %v1107_v53 = vpop.xlane.xlu0 %1106  ;;  %v1104_v48 = vpop.xlane.xlu1 %1103 }
 0x3d7   : > { %1869 = vrcp.f32 %v1107_v53  ;;  %1297 = vmatprep.subr.mxu1 %v1240_v12 }
 0x3d8   : > { %v1862_v47 = vpop.eup %1861  ;;  %1298 = vmatpush1.xpose.msra.mxu1 %v1239_v14  ;;  %1871 = vrcp.f32 %v1104_v48  ;;  %v2958_v14 = vld [vmem:[#allocation9_spill] sm:$0xff] }
 0x3d9   : > { %v1238_v8 = vmul.f32 %v1862_v47, %v2524_v18  ;;  %v1237_v60 = vmul.f32 %v1862_v47, %v2519_v0 }
 0x3da   : > { %v1101_v44 = vpop.xlane.xlu0 %1100  ;;  %v1098_v52 = vpop.xlane.xlu1 %1097 }
 0x3db   : > { %1299 = vmatprep.subr.mxu1 %v1238_v8  ;;  %1873 = vrcp.f32 %v1101_v44 }
 0x3dc   : > { %v1864_v1 = vpop.eup %1863  ;;  %1300 = vmatpush1.xpose.msra.mxu1 %v1237_v60  ;;  %1875 = vrcp.f32 %v1098_v52 }
 0x3dd   : > { %v1236_v35 = vmul.f32 %v1864_v1, %v2530_v63  ;;  %v1235_v13 = vmul.f32 %v1864_v1, %v2526_v36 }
 0x3de   : > { %v1095_v26 = vpop.xlane.xlu0 %1094 }
 0x3df   : > { %1301 = vmatprep.subr.mxu1 %v1236_v35  ;;  %1877 = vrcp.f32 %v1095_v26 }
 0x3e0   : > { %v1866_v6 = vpop.eup %1865  ;;  %1302 = vmatpush1.xpose.msra.mxu1 %v1235_v13 }
 0x3e1   : > { %v1868_v10 = vpop.eup %1867  ;;  %v1232_v0 = vmul.f32 %v1866_v6, %v2540_v32  ;;  %v1231_v36 = vmul.f32 %v1866_v6, %v2536_v28 }
 0x3e2   : > { %v1234_v7 = vmul.f32 %v1868_v10, %v2534_v24  ;;  %v1233_v18 = vmul.f32 %v1868_v10, %v2532_v16 }
 0x3e4   : > { %1303 = vmatprep.subr.mxu1 %v1234_v7  ;;  %v1870_v55 = vpop.eup %1869 }
 0x3e5   : > { %1304 = vmatpush1.xpose.msra.mxu1 %v1233_v18  ;;  %v1230_v63 = vmul.f32 %v1870_v55, %v2546_v11  ;;  %v1872_v21 = vpop.eup %1871  ;;  %v1229_v24 = vmul.f32 %v1870_v55, %v2542_v57  ;;  %v2957_v57 = vld [vmem:[#allocation11_spill] sm:$0xff] }
 0x3e6   : > { %1305 = vmatprep.subr.mxu1 %v1232_v0  ;;  %v1228_v16 = vmul.f32 %v1872_v21, %v2552_v4  ;;  %v1227_v30 = vmul.f32 %v1872_v21, %v2956_v46 }
 0x3e8   : > { %v1874_v20 = vpop.eup %1873 }
 0x3e9   : > { %1306 = vmatpush1.xpose.msra.mxu1 %v1231_v36  ;;  %v1226_v28 = vmul.f32 %v1874_v20, %v2558_v59  ;;  %v1876_v25 = vpop.eup %1875  ;;  %v1225_v15 = vmul.f32 %v1874_v20, %v2554_v54 }
 0x3ea   : > { %1307 = vmatprep.subr.mxu1 %v1230_v63  ;;  %v1185_v51 = vpop.xlane.xlu0 %1184  ;;  %v1224_v34 = vmul.f32 %v1876_v25, %v2957_v57  ;;  %v1223_v53 = vmul.f32 %v1876_v25, %v2958_v14 }
 0x3eb   : > { %1879 = vrcp.f32 %v1185_v51 }
 0x3ec   : > { %v1878_v4 = vpop.eup %1877 }
 0x3ed   : > { %1308 = vmatpush1.xpose.msra.mxu1 %v1229_v24  ;;  %v1222_v47 = vmul.f32 %v1878_v4, %v2578_v17  ;;  %v1221_v59 = vmul.f32 %v1878_v4, %v2573_v43 }
 0x3ee   : > { %1309 = vmatprep.subr.mxu1 %v1228_v16  ;;  %v1179_v12 = vpop.xlane.xlu0 %1178 }
 0x3f0   : > { %v1188_v32 = vpop.xlane.xlu1 %1187 }
 0x3f1   : > { %1881 = vrcp.f32 %v1188_v32  ;;  %1310 = vmatpush1.xpose.msra.mxu1 %v1227_v30 }
 0x3f2   : > { %1311 = vmatprep.subr.mxu1 %v1226_v28  ;;  %v1173_v60 = vpop.xlane.xlu0 %1172 }
 0x3f4   : > { %v1182_v11 = vpop.xlane.xlu1 %1181 }
 0x3f5   : > { %1883 = vrcp.f32 %v1182_v11  ;;  %1312 = vmatpush1.xpose.msra.mxu1 %v1225_v15 }
 0x3f6   : > { %1313 = vmatprep.subr.mxu1 %v1224_v34  ;;  %1885 = vrcp.f32 %v1179_v12 }
 0x3f8   : > { %v1176_v48 = vpop.xlane.xlu1 %1175  ;;  %v1880_v8 = vpop.eup %1879 }
 0x3f9   : > { %1314 = vmatpush1.xpose.msra.mxu1 %v1223_v53  ;;  %1887 = vrcp.f32 %v1176_v48  ;;  %v1282_v35 = vmul.f32 %v1880_v8, %v2592_v29  ;;  %v1281_v6 = vmul.f32 %v1880_v8, %v2590_v33  ;;  %v2961_v48 = vld [vmem:[#allocation20_spill] sm:$0xff] }
 0x3fa   : > { %1315 = vmatprep.subr.mxu1 %v1222_v47  ;;  %1889 = vrcp.f32 %v1173_v60 }
 0x3fc   : > { %v1170_v17 = vpop.xlane.xlu1 %1169 }
 0x3fd   : > { %1316 = vmatpush1.xpose.msra.mxu1 %v1221_v59  ;;  %1891 = vrcp.f32 %v1170_v17 }
 0x3fe   : > { %v1882_v54 = vpop.eup %1881  ;;  %v1167_v52 = vpop.xlane.xlu0 %1166 }
 0x3ff   : > { %v1284_v1 = vmul.f32 %v1882_v54, %v2606_v58  ;;  %v1283_v44 = vmul.f32 %v1882_v54, %v2602_v3  ;;  %1893 = vrcp.f32 %v1167_v52  ;;  %v1356_v52 = vld [vmem:[%s2877_s3] sm:$0xff] }
 0x401   : > { %1317 = vmatprep.subr.mxu1 %v1284_v1 }
 0x402   : > { %v1884_v13 = vpop.eup %1883  ;;  %1318 = vmatpush2.xpose.msra.mxu1 %v1283_v44  ;;  %v1164_v29 = vpop.xlane.xlu1 %1163 }
 0x403   : > { %1319 = vmatprep.subr.mxu1 %v1282_v35  ;;  %v1280_v43 = vmul.f32 %v1884_v13, %v2620_v2  ;;  %v1886_v10 = vpop.eup %1885  ;;  %v1279_v58 = vmul.f32 %v1884_v13, %v2616_v49  ;;  %1895 = vrcp.f32 %v1164_v29  ;;  %v2966_v13 = vld [vmem:[#allocation19_spill] sm:$0xff] }
 0x404   : > { %v1278_v3 = vmul.f32 %v1886_v10, %v2600_v22  ;;  %v1277_v18 = vmul.f32 %v1886_v10, %v2598_v31  ;;  %v1359_v29 = vld [vmem:[%s2877_s3 + $0x18] sm:$0xff] }
 0x406   : > { %1320 = vmatpush2.xpose.msra.mxu1 %v1281_v6  ;;  %v1888_v7 = vpop.eup %1887  ;;  %v1161_v2 = vpop.xlane.xlu0 %1160  ;;  %v1491_v6 = vld [vmem:[#allocation2] sm:$0x1] }
 0x407   : > { %1321 = vmatprep.subr.mxu1 %v1280_v43  ;;  %v1276_v33 = vmul.f32 %v1888_v7, %v2628_v62  ;;  %v1890_v0 = vpop.eup %1889  ;;  %v1275_v55 = vmul.f32 %v1888_v7, %v2624_v40  ;;  %1897 = vrcp.f32 %v1161_v2  ;;  %v373_v40 = vpop.f32.mrf.mxu0  ;;  %1663 = vpush %v1491_v6  ;;  %v1358_v7 = vld [vmem:[%s2877_s3 + $0x10] sm:$0xff] }
 0x408   : > { %v1274_v49 = vmul.f32 %v1890_v0, %v2614_v27  ;;  %v1273_v36 = vmul.f32 %v1890_v0, %v2610_v9 }
 0x409   : > { %v375_v20 = vpop.f32.mrf.mxu0 }
 0x40a   : > { %1322 = vmatpush2.xpose.msra.mxu1 %v1279_v58  ;;  %v1892_v26 = vpop.eup %1891  ;;  %v1158_v22 = vpop.xlane.xlu1 %1157  ;;  %v2967_v58 = vmov 0.0  }
 0x40b   : > { %1323 = vmatprep.subr.mxu1 %v1278_v3  ;;  %1899 = vrcp.f32 %v1158_v22  ;;  %v1272_v31 = vmul.f32 %v1892_v26, %v2636_v19  ;;  %v1271_v24 = vmul.f32 %v1892_v26, %v2634_v56  ;;  %v1357_v3 = vld [vmem:[%s2877_s3 + $0x8] sm:$0xff] }
 0x40c   : > { %v1894_v63 = vpop.eup %1893 }
 0x40d   : > { %v1270_v27 = vmul.f32 %v1894_v63, %v2644_v42  ;;  %v1269_v9 = vmul.f32 %v1894_v63, %v2642_v41  ;;  %v2959_v42 = vld [vmem:[#allocation10_spill] sm:$0xff]  ;;  %v2960_v41 = vld [vmem:[#allocation12_spill] sm:$0xff] }
 0x40e   : > { %1324 = vmatpush2.xpose.msra.mxu1 %v1277_v18  ;;  %v1155_v62 = vpop.xlane.xlu0 %1154 }
 0x40f   : > { %1325 = vmatprep.subr.mxu1 %v1276_v33  ;;  %1901 = vrcp.f32 %v1155_v62 }
 0x410   : > { %v1896_v51 = vpop.eup %1895 }
 0x411   : > { %v1268_v19 = vmul.f32 %v1896_v51, %v2652_v39  ;;  %v1267_v28 = vmul.f32 %v1896_v51, %v2650_v38 }
 0x412   : > { %1326 = vmatpush2.xpose.msra.mxu1 %v1275_v55  ;;  %v1152_v21 = vpop.xlane.xlu1 %1151 }
 0x413   : > { %1327 = vmatprep.subr.mxu1 %v1274_v49  ;;  %1903 = vrcp.f32 %v1152_v21 }
 0x414   : > { %v1898_v32 = vpop.eup %1897 }
 0x415   : > { %v1266_v25 = vmul.f32 %v1898_v32, %v2959_v42  ;;  %v1265_v15 = vmul.f32 %v1898_v32, %v2960_v41 }
 0x416   : > { %1328 = vmatpush2.xpose.msra.mxu1 %v1273_v36  ;;  %v1149_v46 = vpop.xlane.xlu0 %1148 }
 0x417   : > { %1329 = vmatprep.subr.mxu1 %v1272_v31  ;;  %1905 = vrcp.f32 %v1149_v46  ;;  %v1911_v31 = vld [vmem:[%s2162_s8] sm:$0xff] }
 0x418   : > { %v1900_v11 = vpop.eup %1899 }
 0x419   : > { %v1264_v39 = vmul.f32 %v1900_v11, %v2668_v45  ;;  %v1263_v4 = vmul.f32 %v1900_v11, %v2666_v50  ;;  %v2962_v50 = vld [vmem:[#allocation22_spill] sm:$0xff] }
 0x41a   : > { %1330 = vmatpush2.xpose.msra.mxu1 %v1271_v24  ;;  %v1146_v16 = vpop.xlane.xlu1 %1145 }
 0x41b   : > { %1331 = vmatprep.subr.mxu1 %v1270_v27  ;;  %1907 = vrcp.f32 %v1146_v16  ;;  %v1912_v27 = vld [vmem:[%s2162_s8 + $0x8] sm:$0xff] }
 0x41c   : > { %v1902_v57 = vpop.eup %1901 }
 0x41d   : > { %v1262_v38 = vmul.f32 %v1902_v57, %v2676_v61  ;;  %v1261_v14 = vmul.f32 %v1902_v57, %v2674_v37  ;;  %v2963_v61 = vld [vmem:[#allocation18_spill] sm:$0xff]  ;;  %v2964_v37 = vld [vmem:[#allocation21_spill] sm:$0xff] }
 0x41e   : > { %1332 = vmatpush2.xpose.msra.mxu1 %v1269_v9  ;;  %v292_v30 = vpop.permute.xlu1 %291  ;;  %v1143_v34 = vpop.xlane.xlu0 %1142 }
 0x41f   : > { %1333 = vmatprep.subr.mxu1 %v1268_v19  ;;  %v376_v56 = vadd.f32 %v375_v20, %v292_v30  ;;  %1909 = vrcp.f32 %v1143_v34  ;;  %v374_v17 = vadd.f32 %v373_v40, %v292_v30  ;;  %v1913_v19 = vld [vmem:[%s2162_s8 + $0x10] sm:$0xff] }
 0x420   : > { %v1904_v12 = vpop.eup %1903 }
 0x421   : > { %1349 = vmatprep.mubr.f32.mxu1 %v376_v56  ;;  %v1260_v53 = vmul.f32 %v1904_v12, %v2682_v23  ;;  %v1259_v45 = vmul.f32 %v1904_v12, %v2680_v5  ;;  %v2965_v23 = vld [vmem:[#allocation16_spill] sm:$0xff]  ;;  %v1916_v12 = vld [vmem:[%s2162_s8 + $0x28] sm:$0xff] }
 0x422   : > { %1334 = vmatpush2.xpose.msra.mxu1 %v1267_v28  ;;  %v1372_v18 = vpop.permute.xlu1 %1371  ;;  %v1914_v28 = vld [vmem:[%s2162_s8 + $0x18] sm:$0xff] }
 0x423   : > { %1335 = vmatprep.subr.mxu1 %v1266_v25 }
 0x424   : > { %v1906_v47 = vpop.eup %1905 }
 0x425   : > { %v1258_v59 = vmul.f32 %v1906_v47, %v2961_v48  ;;  %v1257_v54 = vmul.f32 %v1906_v47, %v2962_v50 }
 0x426   : > { %1336 = vmatpush2.xpose.msra.mxu1 %v1265_v15  ;;  %v1367_v33 = vpop.permute.xlu0 %1366  ;;  %v1377_v24 = vpop.permute.xlu1 %1376 }
 0x427   : > { %1337 = vmatprep.subr.mxu1 %v1264_v39  ;;  %v1915_v39 = vld [vmem:[%s2162_s8 + $0x20] sm:$0xff] }
 0x428   : > { %v1908_v8 = vpop.eup %1907 }
 0x429   : > { %v1256_v60 = vmul.f32 %v1908_v8, %v2963_v61  ;;  %v1255_v44 = vmul.f32 %v1908_v8, %v2964_v37  ;;  %v1918_v8 = vld [vmem:[%s2162_s8 + $0x38] sm:$0xff] }
 0x42a   : > { %1338 = vmatpush2.xpose.msra.mxu1 %v1263_v4  ;;  %v1382_v41 = vpop.permute.xlu1 %1381 }
 0x42b   : > { %1339 = vmatprep.subr.mxu1 %v1262_v38 }
 0x42c   : > { %v1910_v1 = vpop.eup %1909 }
 0x42d   : > { %v1254_v35 = vmul.f32 %v1910_v1, %v2965_v23  ;;  %v1253_v5 = vmul.f32 %v1910_v1, %v2966_v13 }
 0x42e   : > { %1340 = vmatpush2.xpose.msra.mxu1 %v1261_v14 }
 0x42f   : > { %1341 = vmatprep.subr.mxu1 %v1260_v53 }
 0x432   : > { %1342 = vmatpush2.xpose.msra.mxu1 %v1259_v45  ;;  %v1917_v45 = vld [vmem:[%s2162_s8 + $0x30] sm:$0xff] }
 0x433   : > { %1343 = vmatprep.subr.mxu1 %v1258_v59 }
 0x436   : > { %1344 = vmatpush2.xpose.msra.mxu1 %v1257_v54 }
 0x437   : > { %1345 = vmatprep.subr.mxu1 %v1256_v60 }
 0x438   : > { %s1664_s22 = spop %1663 }
 0x439   : > { %v1493_v2 = vstv %s1664_s22 }
 0x43a   : > { %1346 = vmatpush2.xpose.msra.mxu1 %v1255_v44 }
 0x43b   : > { %1347 = vmatprep.subr.mxu1 %v1254_v35 }
 0x43e   : > { %1348 = vmatpush2.xpose.msra.mxu1 %v1253_v5 }
 0x441   : > { %1350 = vmatmul.mubr.f32.vlgmr.msra.gmra.mxu1 %v374_v17 }
 0x501   : > { %v1351_v43 = vpop.f32.mrf.mxu1 }
 0x503   : > { %v1353_v10 = vpop.f32.mrf.mxu1 }
 0x504   : > { %1650 = vmatprep.subr.msk.mxu0 %vm543_vm1, %v1353_v10 }
 0x505   : > { %1651 = vmatpush1.msk.msra.mxu0 %vm543_vm1, %v1351_v43 }
 0x506   : > { %1652 = vmatmul.mubr.msk.f32.vlgmr.msra.gmra.mxu0 %vm446_vm2, %v1356_v52 }
 0x507   : > { %1472 = vmatprep.mubr.f32.mxu0 %v2967_v58 }
 0x50a   : > { %1653 = vmatmul.mubr.msk.f32.gmra.mxu0 %vm446_vm2, %v1357_v3 }
 0x50b   : > { %1478 = vmatprep.mubr.f32.mxu0 %v2967_v58 }
 0x50e   : > { %1654 = vmatmul.mubr.msk.f32.gmra.mxu0 %vm446_vm2, %v1358_v7 }
 0x50f   : > { %1484 = vmatprep.mubr.f32.mxu0 %v2967_v58 }
 0x512   : > { %1655 = vmatmul.mubr.msk.f32.gmra.mxu0 %vm446_vm2, %v1359_v29 }
 0x5c6   : > { %v1468_v0 = vpop.f32.mrf.mxu0 }
 0x5c7   : > { %v1469_v55 = vadd.f32 %v1468_v0, %v1367_v33 }
 0x5c8   : > { %v1470_v49 = vpop.f32.mrf.mxu0 }
 0x5c9   : > { %v1494_v26 = vmul.f32 %v1493_v2, %v1469_v55  ;;  %v1471_v22 = vadd.f32 %v1470_v49, %v1367_v33 }
 0x5ca   : > { %v1474_v36 = vpop.f32.mrf.mxu0 }
 0x5cb   : > { %v1502_v63 = vadd.f32 %v1911_v31, %v1494_v26  ;;  %v1495_v62 = vmul.f32 %v1493_v2, %v1471_v22  ;;  %v1475_v21 = vadd.f32 %v1474_v36, %v1372_v18 }
 0x5cc   : > { %v1476_v40 = vpop.f32.mrf.mxu0 }
 0x5cd   : > { %1510 = vst [vmem:[%s2807_s30] sm:$0xff] %v1502_v63  ;;  %v1503_v51 = vadd.f32 %v1912_v27, %v1495_v62  ;;  %v1496_v16 = vmul.f32 %v1493_v2, %v1475_v21  ;;  %v1477_v9 = vadd.f32 %v1476_v40, %v1372_v18 }
 0x5ce   : > { %v1480_v20 = vpop.f32.mrf.mxu0 }
 0x5cf   : > { %1511 = vst [vmem:[%s2807_s30 + $0x8] sm:$0xff] %v1503_v51  ;;  %v1504_v32 = vadd.f32 %v1913_v19, %v1496_v16  ;;  %v1497_v46 = vmul.f32 %v1493_v2, %v1477_v9  ;;  %v1481_v30 = vadd.f32 %v1480_v20, %v1377_v24 }
 0x5d0   : > { %v1482_v56 = vpop.f32.mrf.mxu0 }
 0x5d1   : > { %1512 = vst [vmem:[%s2807_s30 + $0x10] sm:$0xff] %v1504_v32  ;;  %v1505_v42 = vadd.f32 %v1914_v28, %v1497_v46  ;;  %v1498_v25 = vmul.f32 %v1493_v2, %v1481_v30  ;;  %v1483_v11 = vadd.f32 %v1482_v56, %v1377_v24 }
 0x5d2   : > { %v1486_v15 = vpop.f32.mrf.mxu0 }
 0x5d3   : > { %1513 = vst [vmem:[%s2807_s30 + $0x18] sm:$0xff] %v1505_v42  ;;  %v1506_v57 = vadd.f32 %v1915_v39, %v1498_v25  ;;  %v1499_v34 = vmul.f32 %v1493_v2, %v1483_v11  ;;  %v1487_v4 = vadd.f32 %v1486_v15, %v1382_v41 }
 0x5d4   : > { %v1488_v38 = vpop.f32.mrf.mxu0 }
 0x5d5   : > { %1514 = vst [vmem:[%s2807_s30 + $0x20] sm:$0xff] %v1506_v57  ;;  %v1507_v14 = vadd.f32 %v1916_v12, %v1499_v34  ;;  %v1500_v53 = vmul.f32 %v1493_v2, %v1487_v4  ;;  %v1489_v47 = vadd.f32 %v1488_v38, %v1382_v41 }
 0x5d7   : > { %1515 = vst [vmem:[%s2807_s30 + $0x28] sm:$0xff] %v1507_v14  ;;  %v1508_v48 = vadd.f32 %v1917_v45, %v1500_v53  ;;  %v1501_v59 = vmul.f32 %v1493_v2, %v1489_v47 }
 0x5d9   : > { %1516 = vst [vmem:[%s2807_s30 + $0x30] sm:$0xff] %v1508_v48  ;;  %v1509_v50 = vadd.f32 %v1918_v8, %v1501_v59 }
 0x5db   : > { %1517 = vst [vmem:[%s2807_s30 + $0x38] sm:$0xff] %v1509_v50 }
 0x5dc   : > { %1960 = shalt.err (!%p1957_p10)
}
 0x5dd   : > { %s1961_s8 = scalar_lea.hbm %s2826_s20, 1024  ;;  %s1965_s18 = scalar_lea.hbm %s2880_s6, 2048 }
 0x5de   : > { %p1962_p0 = scmp.ne.s32.totalorder %s2826_s20, %s1961_s8  ;;  %p1966_p1 = scmp.lt.s32.totalorder %s2826_s20, %s2880_s6 }
 0x5df   : > { %p1967_p3 = scmp.lt.s32.totalorder %s1965_s18, %s1961_s8 }
 0x5e0   : > { %p1963_p2 = pnand %p1962_p0, %p2968_p12 }
 0x5e1   : > { %p1968_p6 = por %p1967_p3, %p1966_p1 }
 0x5e2   : > { %p1964_p9 = pneg %p1963_p2 }
 0x5e4   : > { %p1969_p11 = pnand %p1968_p6, %p1964_p9 }
 0x5e6   : > { %1972 = shalt.err (!%p1969_p11)
}
 0x5e7   : > { %s2019_s29 = smov 256   ;;  %s2020_s17 = smov 16  }
 0x5e8   : > { %1667 = dma.vmem_to_hbm [thread:$0]  (%p2968_p12), %s2828_s9, 1024, %s2826_s20, %s1519_s5, %s2019_s29, %s2019_s29, %s2020_s17  }
 0x5e9 PF: > { %s1547_s19 = sand.u32 1, %s1999_s23   ;;  %p2969_p13 = scmp.ne.s32.totalorder %s2913_s11, 0 }
 0x5ea   : > { %p2970_p4 = scmp.ge.s32.totalorder %s2011_s26, 2  ;;  %s1548_s21 = scalar_lea.sflag [#allocation5], %s1547_s19 }
 0x5ec   : > { %p1674_p5 = pnand %p2970_p4, %p2969_p13 }
 0x5ee   : > { %p1675_p7 = pneg %p1674_p5 }
 0x5f0   : > { %1994 = dma.done.wait (%p1675_p7), %s1548_s21, 1024  }
 0x5f1   : > { %1996 = vsyncadd (%p1675_p7), %s1548_s21, 4294966272  ;;  %p21_p8 = scmp.ge.s32.totalorder %s2084_s28, 4   ;;  %s2971_s23 = smov %s2003_s24 }
 0x5f2   : > { %s2972_s24 = smov %s2007_s25  ;;  %s2973_s25 = smov %s2096_s7 }
 0x5f3   : > { %s2974_s26 = smov %s2084_s28  ;;  %23 = sbr.rel (!%p21_p8) target bundleno = 8 (0x8), region = 89 }
 0x5f8   :  { %1553 = vsyncpa [#allocation4], 1 }
 0x5f9   :  { %1555 = vsyncpa [#allocation4 + $0x1], 1 }
 0x5fa   :  { %1556 = vsyncpa [#allocation5], 1 }
 0x5fb   :  { %1558 = vsyncpa [#allocation5 + $0x1], 1 }

</bundles_post_ra>
